<compile_context>
chip_gen: v6e
topology: v6e:2x2x1
jax: 0.10.0
libtpu: 0.0.40
codegen_flags: <defaults>
</compile_context>

<pallas_src>
import functools

import jax
import jax.numpy as jnp
from jax.experimental import pallas as pl
from jax.experimental.pallas import tpu as pltpu


# ----------------------------------------------------------------------------
# Fused SEBottleneck kernel (one image per grid step, everything in VMEM).
# ----------------------------------------------------------------------------
def _se_bottleneck_kernel(x_ref, w1_ref, s1_ref, b1_ref,
                          w2_ref, s2_ref, b2_ref,
                          w3_ref, s3_ref, b3_ref,
                          fc1_ref, fc2_ref,
                          o_ref,
                          pad_ref, acc_ref, *, H, W, pad_top):
    f32 = jnp.float32
    bf16 = jnp.bfloat16
    HW = H * W

    x = x_ref[0]                                               # (HW, Cin) f32

    # --- conv1 (1x1) + bn1 + relu:  (HW, Cin) @ (Cin, C1) on the MXU --------
    o1 = jnp.dot(x.astype(bf16), w1_ref[...], preferred_element_type=f32)
    o1 = jnp.maximum(o1 * s1_ref[...] + b1_ref[...], 0.0)      # (HW, C1) f32

    # --- conv2 (3x3, stride 1, pad 1) + bn2 + relu --------------------------
    # o1 is copied into the middle of a zero-initialised, row-flattened VMEM
    # scratch (zero rows above/below provide the top/bottom halo).  Each of
    # the 9 taps is then a shifted flat view -> one clean (HW,C1)x(C1,C1) MXU
    # matmul accumulated in an f32 VMEM scratch.  Reads that would wrap across
    # image columns (left/right halo) are masked to zero.
    pad_ref[...] = jnp.zeros_like(pad_ref)
    pad_ref[pad_top:pad_top + HW, :] = o1
    acc_ref[...] = jnp.zeros_like(acc_ref)

    col = jax.lax.broadcasted_iota(jnp.int32, (HW, o1.shape[1]), 0) % W
    for dy in (-1, 0, 1):
        for dx in (-1, 0, 1):
            start = pad_top + dy * W + dx                      # static offset
            patch = pad_ref[start:start + HW, :]               # (HW, C1) f32
            if dx != 0:
                ok = (col + dx >= 0) & (col + dx < W)
                patch = jnp.where(ok, patch, 0.0)
            acc_ref[...] += jnp.dot(patch.astype(bf16),
                                    w2_ref[dy + 1, dx + 1],
                                    preferred_element_type=f32)
    o2 = jnp.maximum(acc_ref[...] * s2_ref[...] + b2_ref[...], 0.0)  # (HW, C1)

    # --- conv3 (1x1) + bn3 (no relu) ----------------------------------------
    o3 = jnp.dot(o2.astype(bf16), w3_ref[...], preferred_element_type=f32)
    o3 = o3 * s3_ref[...] + b3_ref[...]                        # (HW, C4) f32

    # --- SE: global avg pool -> fc1 -> relu -> fc2 -> sigmoid ---------------
    pooled = jnp.sum(o3, axis=0, keepdims=True) * (1.0 / HW)   # (1, C4)
    h = jnp.maximum(
        jnp.dot(pooled.astype(bf16), fc1_ref[...], preferred_element_type=f32),
        0.0)
    gate = jax.nn.sigmoid(
        jnp.dot(h.astype(bf16), fc2_ref[...], preferred_element_type=f32))

    # --- channel-wise scale + identity residual + final relu ----------------
    o_ref[0] = jnp.maximum(o3 * gate + x, 0.0).astype(o_ref.dtype)


# ----------------------------------------------------------------------------
# Wrapper: one fused pallas_call over the batch.
# ----------------------------------------------------------------------------
def se_bottleneck_forward(x_nchw, p):
    N, Cin, H, W = x_nchw.shape
    C1 = p["w1"].shape[1]
    C4 = p["w3"].shape[1]
    Cr = p["fc1"].shape[1]
    assert Cin == C4, "identity residual needs inplanes == 4*planes"
    HW = H * W

    # TODO(synk): fold the NCHW<->NHWC layout change into the kernel itself
    # (in-kernel transpose) instead of XLA transposes in glue.
    x_flat = jnp.transpose(x_nchw, (0, 2, 3, 1)).reshape(N, HW, Cin)
    x_flat = x_flat.astype(jnp.float32)

    # Row-flattened halo buffer: pad_top zero rows above and below the image
    # (pad_top >= W+1, rounded to a sublane multiple so the o1 copy is aligned).
    pad_top = ((W + 1 + 7) // 8) * 8
    pad_rows = 2 * pad_top + HW

    kern = functools.partial(_se_bottleneck_kernel, H=H, W=W, pad_top=pad_top)

    out_flat = pl.pallas_call(
        kern,
        out_shape=jax.ShapeDtypeStruct((N, HW, C4), jnp.float32),
        grid_spec=pltpu.PrefetchScalarGridSpec(
            num_scalar_prefetch=0,
            grid=(N,),
            in_specs=[
                pl.BlockSpec((1, HW, Cin), lambda b: (b, 0, 0)),     # x / residual
                pl.BlockSpec((Cin, C1), lambda b: (0, 0)),           # w1 (bf16)
                pl.BlockSpec((1, C1), lambda b: (0, 0)),             # bn1 scale
                pl.BlockSpec((1, C1), lambda b: (0, 0)),             # bn1 bias
                pl.BlockSpec((3, 3, C1, C1), lambda b: (0, 0, 0, 0)),# w2 (bf16)
                pl.BlockSpec((1, C1), lambda b: (0, 0)),             # bn2 scale
                pl.BlockSpec((1, C1), lambda b: (0, 0)),             # bn2 bias
                pl.BlockSpec((C1, C4), lambda b: (0, 0)),            # w3 (bf16)
                pl.BlockSpec((1, C4), lambda b: (0, 0)),             # bn3 scale
                pl.BlockSpec((1, C4), lambda b: (0, 0)),             # bn3 bias
                pl.BlockSpec((C4, Cr), lambda b: (0, 0)),            # se fc1 (bf16)
                pl.BlockSpec((Cr, C4), lambda b: (0, 0)),            # se fc2 (bf16)
            ],
            out_specs=pl.BlockSpec((1, HW, C4), lambda b: (b, 0, 0)),
            scratch_shapes=[
                pltpu.VMEM((pad_rows, C1), jnp.float32),   # zero-padded o1
                pltpu.VMEM((HW, C1), jnp.float32),         # 3x3 accumulator
            ],
        ),
        compiler_params=pltpu.CompilerParams(
            dimension_semantics=("parallel",),
            vmem_limit_bytes=32 * 1024 * 1024,
        ),
    )(x_flat,
      p["w1"].astype(jnp.bfloat16), p["s1"], p["b1"],
      p["w2"].astype(jnp.bfloat16), p["s2"], p["b2"],
      p["w3"].astype(jnp.bfloat16), p["s3"], p["b3"],
      p["fc1"].astype(jnp.bfloat16), p["fc2"].astype(jnp.bfloat16))

    return jnp.transpose(out_flat.reshape(N, H, W, C4), (0, 3, 1, 2))


# ----------------------------------------------------------------------------
# Deterministic parameter construction (BN folded to scale/bias, eps = 1e-5).
# ----------------------------------------------------------------------------
def make_params(key, inplanes, planes, reduction=16, eps=1e-5):
    c4 = planes * 4
    cr = c4 // reduction
    keys = jax.random.split(key, 17)

    def bn_fold(kg, kb, km, kv, c):
        gamma = 1.0 + 0.1 * jax.random.normal(kg, (c,), jnp.float32)
        beta = 0.05 * jax.random.normal(kb, (c,), jnp.float32)
        mean = 0.01 * jax.random.normal(km, (c,), jnp.float32)
        var = 1.0 + 0.1 * jnp.abs(jax.random.normal(kv, (c,), jnp.float32))
        scale = gamma / jnp.sqrt(var + eps)
        bias = beta - mean * scale
        return scale.reshape(1, c), bias.reshape(1, c)

    s1, b1 = bn_fold(keys[3], keys[4], keys[5], keys[6], planes)
    s2, b2 = bn_fold(keys[7], keys[8], keys[9], keys[10], planes)
    s3, b3 = bn_fold(keys[11], keys[12], keys[13], keys[14], c4)

    return {
        # conv weights stored as (Cin, Cout) / (kh, kw, Cin, Cout) for NHWC matmuls
        "w1": 0.1 * jax.random.normal(keys[0], (inplanes, planes), jnp.float32),
        "w2": 0.1 * jax.random.normal(keys[1], (3, 3, planes, planes), jnp.float32),
        "w3": 0.1 * jax.random.normal(keys[2], (planes, c4), jnp.float32),
        "s1": s1, "b1": b1, "s2": s2, "b2": b2, "s3": s3, "b3": b3,
        # SE FC weights stored transposed (in, out), i.e. W^T of nn.Linear
        "fc1": 0.3 * jax.random.normal(keys[15], (c4, cr), jnp.float32),
        "fc2": 0.3 * jax.random.normal(keys[16], (cr, c4), jnp.float32),
    }


# ----------------------------------------------------------------------------
# Pure-JAX f32 reference (module semantics) for a sanity check.
# ----------------------------------------------------------------------------
def reference_forward(x_nchw, p):
    x = jnp.transpose(x_nchw, (0, 2, 3, 1)).astype(jnp.float32)
    o = jnp.maximum(jnp.einsum("nhwc,cd->nhwd", x, p["w1"]) * p["s1"] + p["b1"], 0.0)
    o = jax.lax.conv_general_dilated(
        o, p["w2"], window_strides=(1, 1), padding="SAME",
        dimension_numbers=("NHWC", "HWIO", "NHWC"))
    o = jnp.maximum(o * p["s2"] + p["b2"], 0.0)
    o3 = jnp.einsum("nhwc,cd->nhwd", o, p["w3"]) * p["s3"] + p["b3"]
    y = jnp.mean(o3, axis=(1, 2))                    # (N, C)
    h = jnp.maximum(y @ p["fc1"], 0.0)
    s = jax.nn.sigmoid(h @ p["fc2"])
    out = jnp.maximum(o3 * s[:, None, None, :] + x, 0.0)
    return jnp.transpose(out, (0, 3, 1, 2))


if __name__ == "__main__":
    # SEBottleneck(inplanes=32, planes=8, stride=1, downsample=None, reduction=16)
    # -> identity residual requires inplanes == planes * 4.
    N, inplanes, planes, H, W = 2, 32, 8, 8, 8

    key = jax.random.PRNGKey(0)
    kx, kp = jax.random.split(key)
    x = jax.random.normal(kx, (N, inplanes, H, W), jnp.float32)  # NCHW like PyTorch
    params = make_params(kp, inplanes, planes)

    fwd = jax.jit(se_bottleneck_forward)
    out = jax.block_until_ready(fwd(x, params))

    ref = reference_forward(x, params)
    assert out.shape == (N, planes * 4, H, W)
    # bf16 matmul operands (f32 accumulation) vs f32 reference -> looser tol.
    assert jnp.allclose(out, ref, atol=2e-2, rtol=2e-2)

    print("KERNEL_OK")
</pallas_src>

<mosaic_0001>
module attributes {stable_mosaic.version = 11 : i64} {
  func.func @_se_bottleneck_kernel(%arg0: i32, %arg1: memref<1x64x32xf32, #tpu.memory_space<vmem>>, %arg2: memref<32x8xbf16, #tpu.memory_space<vmem>>, %arg3: memref<1x8xf32, #tpu.memory_space<vmem>>, %arg4: memref<1x8xf32, #tpu.memory_space<vmem>>, %arg5: memref<3x3x8x8xbf16, #tpu.memory_space<vmem>>, %arg6: memref<1x8xf32, #tpu.memory_space<vmem>>, %arg7: memref<1x8xf32, #tpu.memory_space<vmem>>, %arg8: memref<8x32xbf16, #tpu.memory_space<vmem>>, %arg9: memref<1x32xf32, #tpu.memory_space<vmem>>, %arg10: memref<1x32xf32, #tpu.memory_space<vmem>>, %arg11: memref<32x2xbf16, #tpu.memory_space<vmem>>, %arg12: memref<2x32xbf16, #tpu.memory_space<vmem>>, %arg13: memref<1x64x32xf32, #tpu.memory_space<vmem>>, %arg14: memref<96x8xf32, #tpu.memory_space<vmem>>, %arg15: memref<64x8xf32, #tpu.memory_space<vmem>>) attributes {dimension_semantics = [#tpu.dimension_semantics<parallel>], iteration_bounds = array<i64: 2>, scalar_prefetch = 0 : i64, scratch_operands = 2 : i64, tpu.core_type = #tpu.core_type<tc>, window_params = [{transform_indices = @transform_0, window_bounds = array<i64: 1, 64, 32>}, {pipeline_mode = #tpu.pipeline_mode<synchronous>, transform_indices = @transform_1, window_bounds = array<i64: 32, 8>}, {pipeline_mode = #tpu.pipeline_mode<synchronous>, transform_indices = @transform_2, window_bounds = array<i64: 1, 8>}, {pipeline_mode = #tpu.pipeline_mode<synchronous>, transform_indices = @transform_3, window_bounds = array<i64: 1, 8>}, {pipeline_mode = #tpu.pipeline_mode<synchronous>, transform_indices = @transform_4, window_bounds = array<i64: 3, 3, 8, 8>}, {pipeline_mode = #tpu.pipeline_mode<synchronous>, transform_indices = @transform_5, window_bounds = array<i64: 1, 8>}, {pipeline_mode = #tpu.pipeline_mode<synchronous>, transform_indices = @transform_6, window_bounds = array<i64: 1, 8>}, {pipeline_mode = #tpu.pipeline_mode<synchronous>, transform_indices = @transform_7, window_bounds = array<i64: 8, 32>}, {pipeline_mode = #tpu.pipeline_mode<synchronous>, transform_indices = @transform_8, window_bounds = array<i64: 1, 32>}, {pipeline_mode = #tpu.pipeline_mode<synchronous>, transform_indices = @transform_9, window_bounds = array<i64: 1, 32>}, {pipeline_mode = #tpu.pipeline_mode<synchronous>, transform_indices = @transform_10, window_bounds = array<i64: 32, 2>}, {pipeline_mode = #tpu.pipeline_mode<synchronous>, transform_indices = @transform_11, window_bounds = array<i64: 2, 32>}, {transform_indices = @transform_12, window_bounds = array<i64: 1, 64, 32>}]} {
    %c0 = arith.constant 0 : index
    %c0_0 = arith.constant 0 : index
    %c0_1 = arith.constant 0 : index
    %0 = vector.load %arg1[%c0, %c0_0, %c0_1] : memref<1x64x32xf32, #tpu.memory_space<vmem>>, vector<1x64x32xf32>
    %1 = vector.shape_cast %0 : vector<1x64x32xf32> to vector<64x32xf32>
    %2 = arith.truncf %1 : vector<64x32xf32> to vector<64x32xbf16>
    %c0_2 = arith.constant 0 : index
    %c0_3 = arith.constant 0 : index
    %3 = vector.load %arg2[%c0_2, %c0_3] : memref<32x8xbf16, #tpu.memory_space<vmem>>, vector<32x8xbf16>
    %cst = arith.constant dense<0.000000e+00> : vector<64x8xf32>
    %4 = tpu.matmul %2, %3, %cst {dimension_numbers = #tpu.dot_dimension_numbers<[1], [0], [0], [1], [0, 0, 1, 1], [], []>} : vector<64x32xbf16>, vector<32x8xbf16>, vector<64x8xf32> -> vector<64x8xf32>
    %c0_4 = arith.constant 0 : index
    %c0_5 = arith.constant 0 : index
    %5 = vector.load %arg3[%c0_4, %c0_5] : memref<1x8xf32, #tpu.memory_space<vmem>>, vector<1x8xf32>
    %6 = vector.broadcast %5 : vector<1x8xf32> to vector<64x8xf32>
    %7 = arith.mulf %4, %6 : vector<64x8xf32>
    %c0_6 = arith.constant 0 : index
    %c0_7 = arith.constant 0 : index
    %8 = vector.load %arg4[%c0_6, %c0_7] : memref<1x8xf32, #tpu.memory_space<vmem>>, vector<1x8xf32>
    %9 = vector.broadcast %8 : vector<1x8xf32> to vector<64x8xf32>
    %10 = arith.addf %7, %9 : vector<64x8xf32>
    %cst_8 = arith.constant 0.000000e+00 : f32
    %11 = vector.broadcast %cst_8 : f32 to vector<64x8xf32>
    %12 = arith.maximumf %10, %11 : vector<64x8xf32>
    %cst_9 = arith.constant 0.000000e+00 : f32
    %13 = vector.broadcast %cst_9 : f32 to vector<96x8xf32>
    %c0_10 = arith.constant 0 : index
    %c0_11 = arith.constant 0 : index
    %14 = vector.load %arg14[%c0_10, %c0_11] : memref<96x8xf32, #tpu.memory_space<vmem>>, vector<96x8xf32>
    tpu.vector_store %arg14[%c0_10, %c0_11], %13 {strides = array<i32>} : memref<96x8xf32, #tpu.memory_space<vmem>>, vector<96x8xf32>,
    %c16 = arith.constant 16 : index
    %c0_12 = arith.constant 0 : index
    %15 = vector.load %arg14[%c16, %c0_12] : memref<96x8xf32, #tpu.memory_space<vmem>>, vector<64x8xf32>
    tpu.vector_store %arg14[%c16, %c0_12], %12 {strides = array<i32>} : memref<96x8xf32, #tpu.memory_space<vmem>>, vector<64x8xf32>,
    %cst_13 = arith.constant 0.000000e+00 : f32
    %16 = vector.broadcast %cst_13 : f32 to vector<64x8xf32>
    %c0_14 = arith.constant 0 : index
    %c0_15 = arith.constant 0 : index
    %17 = vector.load %arg15[%c0_14, %c0_15] : memref<64x8xf32, #tpu.memory_space<vmem>>, vector<64x8xf32>
    tpu.vector_store %arg15[%c0_14, %c0_15], %16 {strides = array<i32>} : memref<64x8xf32, #tpu.memory_space<vmem>>, vector<64x8xf32>,
    %18 = tpu.iota {dimensions = array<i32: 0>} : vector<64x8xi32>
    %c8_i32 = arith.constant 8 : i32
    %c0_i32 = arith.constant 0 : i32
    %19 = arith.cmpi eq, %c8_i32, %c0_i32 : i32
    %c1_i32 = arith.constant 1 : i32
    %20 = arith.select %19, %c1_i32, %c8_i32 : i32
    %21 = vector.broadcast %20 : i32 to vector<64x8xi32>
    %22 = arith.remsi %18, %21 : vector<64x8xi32>
    %c0_i32_16 = arith.constant 0 : i32
    %23 = vector.broadcast %c0_i32_16 : i32 to vector<64x8xi32>
    %24 = arith.cmpi ne, %22, %23 : vector<64x8xi32>
    %c0_i32_17 = arith.constant 0 : i32
    %25 = vector.broadcast %c0_i32_17 : i32 to vector<64x8xi32>
    %26 = arith.cmpi slt, %22, %25 : vector<64x8xi32>
    %c0_i32_18 = arith.constant 0 : i32
    %27 = arith.cmpi slt, %20, %c0_i32_18 : i32
    %28 = vector.broadcast %27 : i1 to vector<64x8xi1>
    %29 = vector.broadcast %28 : vector<64x8xi1> to vector<64x8xi1>
    %30 = arith.xori %26, %29 : vector<64x8xi1>
    %31 = arith.andi %30, %24 : vector<64x8xi1>
    %32 = vector.broadcast %20 : i32 to vector<64x8xi32>
    %33 = arith.addi %22, %32 : vector<64x8xi32>
    %34 = arith.select %31, %33, %22 : vector<64x8xi1>, vector<64x8xi32>
    %c7 = arith.constant 7 : index
    %c0_19 = arith.constant 0 : index
    %35 = vector.load %arg14[%c7, %c0_19] : memref<96x8xf32, #tpu.memory_space<vmem>>, vector<64x8xf32>
    %c-1_i32 = arith.constant -1 : i32
    %36 = vector.broadcast %c-1_i32 : i32 to vector<64x8xi32>
    %37 = arith.addi %34, %36 : vector<64x8xi32>
    %c0_i32_20 = arith.constant 0 : i32
    %38 = vector.broadcast %c0_i32_20 : i32 to vector<64x8xi32>
    %39 = arith.cmpi sge, %37, %38 : vector<64x8xi32>
    %c-1_i32_21 = arith.constant -1 : i32
    %40 = vector.broadcast %c-1_i32_21 : i32 to vector<64x8xi32>
    %41 = arith.addi %34, %40 : vector<64x8xi32>
    %c8_i32_22 = arith.constant 8 : i32
    %42 = vector.broadcast %c8_i32_22 : i32 to vector<64x8xi32>
    %43 = arith.cmpi slt, %41, %42 : vector<64x8xi32>
    %44 = arith.andi %39, %43 : vector<64x8xi1>
    %cst_23 = arith.constant 0.000000e+00 : f32
    %45 = vector.broadcast %cst_23 : f32 to vector<64x8xf32>
    %46 = arith.select %44, %35, %45 : vector<64x8xi1>, vector<64x8xf32>
    %c0_24 = arith.constant 0 : index
    %c0_25 = arith.constant 0 : index
    %47 = vector.load %arg15[%c0_24, %c0_25] : memref<64x8xf32, #tpu.memory_space<vmem>>, vector<64x8xf32>
    %48 = arith.truncf %46 : vector<64x8xf32> to vector<64x8xbf16>
    %c0_26 = arith.constant 0 : index
    %c0_27 = arith.constant 0 : index
    %c0_28 = arith.constant 0 : index
    %c0_29 = arith.constant 0 : index
    %49 = vector.load %arg5[%c0_26, %c0_27, %c0_28, %c0_29] : memref<3x3x8x8xbf16, #tpu.memory_space<vmem>>, vector<1x1x8x8xbf16>
    %50 = vector.shape_cast %49 : vector<1x1x8x8xbf16> to vector<8x8xbf16>
    %cst_30 = arith.constant dense<0.000000e+00> : vector<64x8xf32>
    %51 = tpu.matmul %48, %50, %cst_30 {dimension_numbers = #tpu.dot_dimension_numbers<[1], [0], [0], [1], [0, 0, 1, 1], [], []>} : vector<64x8xbf16>, vector<8x8xbf16>, vector<64x8xf32> -> vector<64x8xf32>
    %52 = arith.addf %47, %51 : vector<64x8xf32>
    %c0_31 = arith.constant 0 : index
    %c0_32 = arith.constant 0 : index
    %53 = vector.load %arg15[%c0_31, %c0_32] : memref<64x8xf32, #tpu.memory_space<vmem>>, vector<64x8xf32>
    tpu.vector_store %arg15[%c0_31, %c0_32], %52 {strides = array<i32>} : memref<64x8xf32, #tpu.memory_space<vmem>>, vector<64x8xf32>,
    %c8 = arith.constant 8 : index
    %c0_33 = arith.constant 0 : index
    %54 = vector.load %arg14[%c8, %c0_33] : memref<96x8xf32, #tpu.memory_space<vmem>>, vector<64x8xf32>
    %c0_34 = arith.constant 0 : index
    %c0_35 = arith.constant 0 : index
    %55 = vector.load %arg15[%c0_34, %c0_35] : memref<64x8xf32, #tpu.memory_space<vmem>>, vector<64x8xf32>
    %56 = arith.truncf %54 : vector<64x8xf32> to vector<64x8xbf16>
    %c0_36 = arith.constant 0 : index
    %c1 = arith.constant 1 : index
    %c0_37 = arith.constant 0 : index
    %c0_38 = arith.constant 0 : index
    %57 = vector.load %arg5[%c0_36, %c1, %c0_37, %c0_38] : memref<3x3x8x8xbf16, #tpu.memory_space<vmem>>, vector<1x1x8x8xbf16>
    %58 = vector.shape_cast %57 : vector<1x1x8x8xbf16> to vector<8x8xbf16>
    %cst_39 = arith.constant dense<0.000000e+00> : vector<64x8xf32>
    %59 = tpu.matmul %56, %58, %cst_39 {dimension_numbers = #tpu.dot_dimension_numbers<[1], [0], [0], [1], [0, 0, 1, 1], [], []>} : vector<64x8xbf16>, vector<8x8xbf16>, vector<64x8xf32> -> vector<64x8xf32>
    %60 = arith.addf %55, %59 : vector<64x8xf32>
    %c0_40 = arith.constant 0 : index
    %c0_41 = arith.constant 0 : index
    %61 = vector.load %arg15[%c0_40, %c0_41] : memref<64x8xf32, #tpu.memory_space<vmem>>, vector<64x8xf32>
    tpu.vector_store %arg15[%c0_40, %c0_41], %60 {strides = array<i32>} : memref<64x8xf32, #tpu.memory_space<vmem>>, vector<64x8xf32>,
    %c9 = arith.constant 9 : index
    %c0_42 = arith.constant 0 : index
    %62 = vector.load %arg14[%c9, %c0_42] : memref<96x8xf32, #tpu.memory_space<vmem>>, vector<64x8xf32>
    %c1_i32_43 = arith.constant 1 : i32
    %63 = vector.broadcast %c1_i32_43 : i32 to vector<64x8xi32>
    %64 = arith.addi %34, %63 : vector<64x8xi32>
    %c0_i32_44 = arith.constant 0 : i32
    %65 = vector.broadcast %c0_i32_44 : i32 to vector<64x8xi32>
    %66 = arith.cmpi sge, %64, %65 : vector<64x8xi32>
    %c1_i32_45 = arith.constant 1 : i32
    %67 = vector.broadcast %c1_i32_45 : i32 to vector<64x8xi32>
    %68 = arith.addi %34, %67 : vector<64x8xi32>
    %c8_i32_46 = arith.constant 8 : i32
    %69 = vector.broadcast %c8_i32_46 : i32 to vector<64x8xi32>
    %70 = arith.cmpi slt, %68, %69 : vector<64x8xi32>
    %71 = arith.andi %66, %70 : vector<64x8xi1>
    %cst_47 = arith.constant 0.000000e+00 : f32
    %72 = vector.broadcast %cst_47 : f32 to vector<64x8xf32>
    %73 = arith.select %71, %62, %72 : vector<64x8xi1>, vector<64x8xf32>
    %c0_48 = arith.constant 0 : index
    %c0_49 = arith.constant 0 : index
    %74 = vector.load %arg15[%c0_48, %c0_49] : memref<64x8xf32, #tpu.memory_space<vmem>>, vector<64x8xf32>
    %75 = arith.truncf %73 : vector<64x8xf32> to vector<64x8xbf16>
    %c0_50 = arith.constant 0 : index
    %c2 = arith.constant 2 : index
    %c0_51 = arith.constant 0 : index
    %c0_52 = arith.constant 0 : index
    %76 = vector.load %arg5[%c0_50, %c2, %c0_51, %c0_52] : memref<3x3x8x8xbf16, #tpu.memory_space<vmem>>, vector<1x1x8x8xbf16>
    %77 = vector.shape_cast %76 : vector<1x1x8x8xbf16> to vector<8x8xbf16>
    %cst_53 = arith.constant dense<0.000000e+00> : vector<64x8xf32>
    %78 = tpu.matmul %75, %77, %cst_53 {dimension_numbers = #tpu.dot_dimension_numbers<[1], [0], [0], [1], [0, 0, 1, 1], [], []>} : vector<64x8xbf16>, vector<8x8xbf16>, vector<64x8xf32> -> vector<64x8xf32>
    %79 = arith.addf %74, %78 : vector<64x8xf32>
    %c0_54 = arith.constant 0 : index
    %c0_55 = arith.constant 0 : index
    %80 = vector.load %arg15[%c0_54, %c0_55] : memref<64x8xf32, #tpu.memory_space<vmem>>, vector<64x8xf32>
    tpu.vector_store %arg15[%c0_54, %c0_55], %79 {strides = array<i32>} : memref<64x8xf32, #tpu.memory_space<vmem>>, vector<64x8xf32>,
    %c15 = arith.constant 15 : index
    %c0_56 = arith.constant 0 : index
    %81 = vector.load %arg14[%c15, %c0_56] : memref<96x8xf32, #tpu.memory_space<vmem>>, vector<64x8xf32>
    %c-1_i32_57 = arith.constant -1 : i32
    %82 = vector.broadcast %c-1_i32_57 : i32 to vector<64x8xi32>
    %83 = arith.addi %34, %82 : vector<64x8xi32>
    %c0_i32_58 = arith.constant 0 : i32
    %84 = vector.broadcast %c0_i32_58 : i32 to vector<64x8xi32>
    %85 = arith.cmpi sge, %83, %84 : vector<64x8xi32>
    %c-1_i32_59 = arith.constant -1 : i32
    %86 = vector.broadcast %c-1_i32_59 : i32 to vector<64x8xi32>
    %87 = arith.addi %34, %86 : vector<64x8xi32>
    %c8_i32_60 = arith.constant 8 : i32
    %88 = vector.broadcast %c8_i32_60 : i32 to vector<64x8xi32>
    %89 = arith.cmpi slt, %87, %88 : vector<64x8xi32>
    %90 = arith.andi %85, %89 : vector<64x8xi1>
    %cst_61 = arith.constant 0.000000e+00 : f32
    %91 = vector.broadcast %cst_61 : f32 to vector<64x8xf32>
    %92 = arith.select %90, %81, %91 : vector<64x8xi1>, vector<64x8xf32>
    %c0_62 = arith.constant 0 : index
    %c0_63 = arith.constant 0 : index
    %93 = vector.load %arg15[%c0_62, %c0_63] : memref<64x8xf32, #tpu.memory_space<vmem>>, vector<64x8xf32>
    %94 = arith.truncf %92 : vector<64x8xf32> to vector<64x8xbf16>
    %c1_64 = arith.constant 1 : index
    %c0_65 = arith.constant 0 : index
    %c0_66 = arith.constant 0 : index
    %c0_67 = arith.constant 0 : index
    %95 = vector.load %arg5[%c1_64, %c0_65, %c0_66, %c0_67] : memref<3x3x8x8xbf16, #tpu.memory_space<vmem>>, vector<1x1x8x8xbf16>
    %96 = vector.shape_cast %95 : vector<1x1x8x8xbf16> to vector<8x8xbf16>
    %cst_68 = arith.constant dense<0.000000e+00> : vector<64x8xf32>
    %97 = tpu.matmul %94, %96, %cst_68 {dimension_numbers = #tpu.dot_dimension_numbers<[1], [0], [0], [1], [0, 0, 1, 1], [], []>} : vector<64x8xbf16>, vector<8x8xbf16>, vector<64x8xf32> -> vector<64x8xf32>
    %98 = arith.addf %93, %97 : vector<64x8xf32>
    %c0_69 = arith.constant 0 : index
    %c0_70 = arith.constant 0 : index
    %99 = vector.load %arg15[%c0_69, %c0_70] : memref<64x8xf32, #tpu.memory_space<vmem>>, vector<64x8xf32>
    tpu.vector_store %arg15[%c0_69, %c0_70], %98 {strides = array<i32>} : memref<64x8xf32, #tpu.memory_space<vmem>>, vector<64x8xf32>,
    %c16_71 = arith.constant 16 : index
    %c0_72 = arith.constant 0 : index
    %100 = vector.load %arg14[%c16_71, %c0_72] : memref<96x8xf32, #tpu.memory_space<vmem>>, vector<64x8xf32>
    %c0_73 = arith.constant 0 : index
    %c0_74 = arith.constant 0 : index
    %101 = vector.load %arg15[%c0_73, %c0_74] : memref<64x8xf32, #tpu.memory_space<vmem>>, vector<64x8xf32>
    %102 = arith.truncf %100 : vector<64x8xf32> to vector<64x8xbf16>
    %c1_75 = arith.constant 1 : index
    %c1_76 = arith.constant 1 : index
    %c0_77 = arith.constant 0 : index
    %c0_78 = arith.constant 0 : index
    %103 = vector.load %arg5[%c1_75, %c1_76, %c0_77, %c0_78] : memref<3x3x8x8xbf16, #tpu.memory_space<vmem>>, vector<1x1x8x8xbf16>
    %104 = vector.shape_cast %103 : vector<1x1x8x8xbf16> to vector<8x8xbf16>
    %cst_79 = arith.constant dense<0.000000e+00> : vector<64x8xf32>
    %105 = tpu.matmul %102, %104, %cst_79 {dimension_numbers = #tpu.dot_dimension_numbers<[1], [0], [0], [1], [0, 0, 1, 1], [], []>} : vector<64x8xbf16>, vector<8x8xbf16>, vector<64x8xf32> -> vector<64x8xf32>
    %106 = arith.addf %101, %105 : vector<64x8xf32>
    %c0_80 = arith.constant 0 : index
    %c0_81 = arith.constant 0 : index
    %107 = vector.load %arg15[%c0_80, %c0_81] : memref<64x8xf32, #tpu.memory_space<vmem>>, vector<64x8xf32>
    tpu.vector_store %arg15[%c0_80, %c0_81], %106 {strides = array<i32>} : memref<64x8xf32, #tpu.memory_space<vmem>>, vector<64x8xf32>,
    %c17 = arith.constant 17 : index
    %c0_82 = arith.constant 0 : index
    %108 = vector.load %arg14[%c17, %c0_82] : memref<96x8xf32, #tpu.memory_space<vmem>>, vector<64x8xf32>
    %c1_i32_83 = arith.constant 1 : i32
    %109 = vector.broadcast %c1_i32_83 : i32 to vector<64x8xi32>
    %110 = arith.addi %34, %109 : vector<64x8xi32>
    %c0_i32_84 = arith.constant 0 : i32
    %111 = vector.broadcast %c0_i32_84 : i32 to vector<64x8xi32>
    %112 = arith.cmpi sge, %110, %111 : vector<64x8xi32>
    %c1_i32_85 = arith.constant 1 : i32
    %113 = vector.broadcast %c1_i32_85 : i32 to vector<64x8xi32>
    %114 = arith.addi %34, %113 : vector<64x8xi32>
    %c8_i32_86 = arith.constant 8 : i32
    %115 = vector.broadcast %c8_i32_86 : i32 to vector<64x8xi32>
    %116 = arith.cmpi slt, %114, %115 : vector<64x8xi32>
    %117 = arith.andi %112, %116 : vector<64x8xi1>
    %cst_87 = arith.constant 0.000000e+00 : f32
    %118 = vector.broadcast %cst_87 : f32 to vector<64x8xf32>
    %119 = arith.select %117, %108, %118 : vector<64x8xi1>, vector<64x8xf32>
    %c0_88 = arith.constant 0 : index
    %c0_89 = arith.constant 0 : index
    %120 = vector.load %arg15[%c0_88, %c0_89] : memref<64x8xf32, #tpu.memory_space<vmem>>, vector<64x8xf32>
    %121 = arith.truncf %119 : vector<64x8xf32> to vector<64x8xbf16>
    %c1_90 = arith.constant 1 : index
    %c2_91 = arith.constant 2 : index
    %c0_92 = arith.constant 0 : index
    %c0_93 = arith.constant 0 : index
    %122 = vector.load %arg5[%c1_90, %c2_91, %c0_92, %c0_93] : memref<3x3x8x8xbf16, #tpu.memory_space<vmem>>, vector<1x1x8x8xbf16>
    %123 = vector.shape_cast %122 : vector<1x1x8x8xbf16> to vector<8x8xbf16>
    %cst_94 = arith.constant dense<0.000000e+00> : vector<64x8xf32>
    %124 = tpu.matmul %121, %123, %cst_94 {dimension_numbers = #tpu.dot_dimension_numbers<[1], [0], [0], [1], [0, 0, 1, 1], [], []>} : vector<64x8xbf16>, vector<8x8xbf16>, vector<64x8xf32> -> vector<64x8xf32>
    %125 = arith.addf %120, %124 : vector<64x8xf32>
    %c0_95 = arith.constant 0 : index
    %c0_96 = arith.constant 0 : index
    %126 = vector.load %arg15[%c0_95, %c0_96] : memref<64x8xf32, #tpu.memory_space<vmem>>, vector<64x8xf32>
    tpu.vector_store %arg15[%c0_95, %c0_96], %125 {strides = array<i32>} : memref<64x8xf32, #tpu.memory_space<vmem>>, vector<64x8xf32>,
    %c23 = arith.constant 23 : index
    %c0_97 = arith.constant 0 : index
    %127 = vector.load %arg14[%c23, %c0_97] : memref<96x8xf32, #tpu.memory_space<vmem>>, vector<64x8xf32>
    %c-1_i32_98 = arith.constant -1 : i32
    %128 = vector.broadcast %c-1_i32_98 : i32 to vector<64x8xi32>
    %129 = arith.addi %34, %128 : vector<64x8xi32>
    %c0_i32_99 = arith.constant 0 : i32
    %130 = vector.broadcast %c0_i32_99 : i32 to vector<64x8xi32>
    %131 = arith.cmpi sge, %129, %130 : vector<64x8xi32>
    %c-1_i32_100 = arith.constant -1 : i32
    %132 = vector.broadcast %c-1_i32_100 : i32 to vector<64x8xi32>
    %133 = arith.addi %34, %132 : vector<64x8xi32>
    %c8_i32_101 = arith.constant 8 : i32
    %134 = vector.broadcast %c8_i32_101 : i32 to vector<64x8xi32>
    %135 = arith.cmpi slt, %133, %134 : vector<64x8xi32>
    %136 = arith.andi %131, %135 : vector<64x8xi1>
    %cst_102 = arith.constant 0.000000e+00 : f32
    %137 = vector.broadcast %cst_102 : f32 to vector<64x8xf32>
    %138 = arith.select %136, %127, %137 : vector<64x8xi1>, vector<64x8xf32>
    %c0_103 = arith.constant 0 : index
    %c0_104 = arith.constant 0 : index
    %139 = vector.load %arg15[%c0_103, %c0_104] : memref<64x8xf32, #tpu.memory_space<vmem>>, vector<64x8xf32>
    %140 = arith.truncf %138 : vector<64x8xf32> to vector<64x8xbf16>
    %c2_105 = arith.constant 2 : index
    %c0_106 = arith.constant 0 : index
    %c0_107 = arith.constant 0 : index
    %c0_108 = arith.constant 0 : index
    %141 = vector.load %arg5[%c2_105, %c0_106, %c0_107, %c0_108] : memref<3x3x8x8xbf16, #tpu.memory_space<vmem>>, vector<1x1x8x8xbf16>
    %142 = vector.shape_cast %141 : vector<1x1x8x8xbf16> to vector<8x8xbf16>
    %cst_109 = arith.constant dense<0.000000e+00> : vector<64x8xf32>
    %143 = tpu.matmul %140, %142, %cst_109 {dimension_numbers = #tpu.dot_dimension_numbers<[1], [0], [0], [1], [0, 0, 1, 1], [], []>} : vector<64x8xbf16>, vector<8x8xbf16>, vector<64x8xf32> -> vector<64x8xf32>
    %144 = arith.addf %139, %143 : vector<64x8xf32>
    %c0_110 = arith.constant 0 : index
    %c0_111 = arith.constant 0 : index
    %145 = vector.load %arg15[%c0_110, %c0_111] : memref<64x8xf32, #tpu.memory_space<vmem>>, vector<64x8xf32>
    tpu.vector_store %arg15[%c0_110, %c0_111], %144 {strides = array<i32>} : memref<64x8xf32, #tpu.memory_space<vmem>>, vector<64x8xf32>,
    %c24 = arith.constant 24 : index
    %c0_112 = arith.constant 0 : index
    %146 = vector.load %arg14[%c24, %c0_112] : memref<96x8xf32, #tpu.memory_space<vmem>>, vector<64x8xf32>
    %c0_113 = arith.constant 0 : index
    %c0_114 = arith.constant 0 : index
    %147 = vector.load %arg15[%c0_113, %c0_114] : memref<64x8xf32, #tpu.memory_space<vmem>>, vector<64x8xf32>
    %148 = arith.truncf %146 : vector<64x8xf32> to vector<64x8xbf16>
    %c2_115 = arith.constant 2 : index
    %c1_116 = arith.constant 1 : index
    %c0_117 = arith.constant 0 : index
    %c0_118 = arith.constant 0 : index
    %149 = vector.load %arg5[%c2_115, %c1_116, %c0_117, %c0_118] : memref<3x3x8x8xbf16, #tpu.memory_space<vmem>>, vector<1x1x8x8xbf16>
    %150 = vector.shape_cast %149 : vector<1x1x8x8xbf16> to vector<8x8xbf16>
    %cst_119 = arith.constant dense<0.000000e+00> : vector<64x8xf32>
    %151 = tpu.matmul %148, %150, %cst_119 {dimension_numbers = #tpu.dot_dimension_numbers<[1], [0], [0], [1], [0, 0, 1, 1], [], []>} : vector<64x8xbf16>, vector<8x8xbf16>, vector<64x8xf32> -> vector<64x8xf32>
    %152 = arith.addf %147, %151 : vector<64x8xf32>
    %c0_120 = arith.constant 0 : index
    %c0_121 = arith.constant 0 : index
    %153 = vector.load %arg15[%c0_120, %c0_121] : memref<64x8xf32, #tpu.memory_space<vmem>>, vector<64x8xf32>
    tpu.vector_store %arg15[%c0_120, %c0_121], %152 {strides = array<i32>} : memref<64x8xf32, #tpu.memory_space<vmem>>, vector<64x8xf32>,
    %c25 = arith.constant 25 : index
    %c0_122 = arith.constant 0 : index
    %154 = vector.load %arg14[%c25, %c0_122] : memref<96x8xf32, #tpu.memory_space<vmem>>, vector<64x8xf32>
    %c1_i32_123 = arith.constant 1 : i32
    %155 = vector.broadcast %c1_i32_123 : i32 to vector<64x8xi32>
    %156 = arith.addi %34, %155 : vector<64x8xi32>
    %c0_i32_124 = arith.constant 0 : i32
    %157 = vector.broadcast %c0_i32_124 : i32 to vector<64x8xi32>
    %158 = arith.cmpi sge, %156, %157 : vector<64x8xi32>
    %c1_i32_125 = arith.constant 1 : i32
    %159 = vector.broadcast %c1_i32_125 : i32 to vector<64x8xi32>
    %160 = arith.addi %34, %159 : vector<64x8xi32>
    %c8_i32_126 = arith.constant 8 : i32
    %161 = vector.broadcast %c8_i32_126 : i32 to vector<64x8xi32>
    %162 = arith.cmpi slt, %160, %161 : vector<64x8xi32>
    %163 = arith.andi %158, %162 : vector<64x8xi1>
    %cst_127 = arith.constant 0.000000e+00 : f32
    %164 = vector.broadcast %cst_127 : f32 to vector<64x8xf32>
    %165 = arith.select %163, %154, %164 : vector<64x8xi1>, vector<64x8xf32>
    %c0_128 = arith.constant 0 : index
    %c0_129 = arith.constant 0 : index
    %166 = vector.load %arg15[%c0_128, %c0_129] : memref<64x8xf32, #tpu.memory_space<vmem>>, vector<64x8xf32>
    %167 = arith.truncf %165 : vector<64x8xf32> to vector<64x8xbf16>
    %c2_130 = arith.constant 2 : index
    %c2_131 = arith.constant 2 : index
    %c0_132 = arith.constant 0 : index
    %c0_133 = arith.constant 0 : index
    %168 = vector.load %arg5[%c2_130, %c2_131, %c0_132, %c0_133] : memref<3x3x8x8xbf16, #tpu.memory_space<vmem>>, vector<1x1x8x8xbf16>
    %169 = vector.shape_cast %168 : vector<1x1x8x8xbf16> to vector<8x8xbf16>
    %cst_134 = arith.constant dense<0.000000e+00> : vector<64x8xf32>
    %170 = tpu.matmul %167, %169, %cst_134 {dimension_numbers = #tpu.dot_dimension_numbers<[1], [0], [0], [1], [0, 0, 1, 1], [], []>} : vector<64x8xbf16>, vector<8x8xbf16>, vector<64x8xf32> -> vector<64x8xf32>
    %171 = arith.addf %166, %170 : vector<64x8xf32>
    %c0_135 = arith.constant 0 : index
    %c0_136 = arith.constant 0 : index
    %172 = vector.load %arg15[%c0_135, %c0_136] : memref<64x8xf32, #tpu.memory_space<vmem>>, vector<64x8xf32>
    tpu.vector_store %arg15[%c0_135, %c0_136], %171 {strides = array<i32>} : memref<64x8xf32, #tpu.memory_space<vmem>>, vector<64x8xf32>,
    %c0_137 = arith.constant 0 : index
    %c0_138 = arith.constant 0 : index
    %173 = vector.load %arg15[%c0_137, %c0_138] : memref<64x8xf32, #tpu.memory_space<vmem>>, vector<64x8xf32>
    %c0_139 = arith.constant 0 : index
    %c0_140 = arith.constant 0 : index
    %174 = vector.load %arg6[%c0_139, %c0_140] : memref<1x8xf32, #tpu.memory_space<vmem>>, vector<1x8xf32>
    %175 = vector.broadcast %174 : vector<1x8xf32> to vector<64x8xf32>
    %176 = arith.mulf %173, %175 : vector<64x8xf32>
    %c0_141 = arith.constant 0 : index
    %c0_142 = arith.constant 0 : index
    %177 = vector.load %arg7[%c0_141, %c0_142] : memref<1x8xf32, #tpu.memory_space<vmem>>, vector<1x8xf32>
    %178 = vector.broadcast %177 : vector<1x8xf32> to vector<64x8xf32>
    %179 = arith.addf %176, %178 : vector<64x8xf32>
    %cst_143 = arith.constant 0.000000e+00 : f32
    %180 = vector.broadcast %cst_143 : f32 to vector<64x8xf32>
    %181 = arith.maximumf %179, %180 : vector<64x8xf32>
    %182 = arith.truncf %181 : vector<64x8xf32> to vector<64x8xbf16>
    %c0_144 = arith.constant 0 : index
    %c0_145 = arith.constant 0 : index
    %183 = vector.load %arg8[%c0_144, %c0_145] : memref<8x32xbf16, #tpu.memory_space<vmem>>, vector<8x32xbf16>
    %cst_146 = arith.constant dense<0.000000e+00> : vector<64x32xf32>
    %184 = tpu.matmul %182, %183, %cst_146 {dimension_numbers = #tpu.dot_dimension_numbers<[1], [0], [0], [1], [0, 0, 1, 1], [], []>} : vector<64x8xbf16>, vector<8x32xbf16>, vector<64x32xf32> -> vector<64x32xf32>
    %c0_147 = arith.constant 0 : index
    %c0_148 = arith.constant 0 : index
    %185 = vector.load %arg9[%c0_147, %c0_148] : memref<1x32xf32, #tpu.memory_space<vmem>>, vector<1x32xf32>
    %186 = vector.broadcast %185 : vector<1x32xf32> to vector<64x32xf32>
    %187 = arith.mulf %184, %186 : vector<64x32xf32>
    %c0_149 = arith.constant 0 : index
    %c0_150 = arith.constant 0 : index
    %188 = vector.load %arg10[%c0_149, %c0_150] : memref<1x32xf32, #tpu.memory_space<vmem>>, vector<1x32xf32>
    %189 = vector.broadcast %188 : vector<1x32xf32> to vector<64x32xf32>
    %190 = arith.addf %187, %189 : vector<64x32xf32>
    %cst_151 = arith.constant dense<0.000000e+00> : vector<32xf32>
    %191 = vector.multi_reduction <add>, %190, %cst_151 [0] : vector<64x32xf32> to vector<32xf32>
    %192 = vector.shape_cast %191 : vector<32xf32> to vector<1x32xf32>
    %cst_152 = arith.constant 1.562500e-02 : f32
    %193 = vector.broadcast %cst_152 : f32 to vector<1x32xf32>
    %194 = arith.mulf %192, %193 : vector<1x32xf32>
    %195 = arith.truncf %194 : vector<1x32xf32> to vector<1x32xbf16>
    %c0_153 = arith.constant 0 : index
    %c0_154 = arith.constant 0 : index
    %196 = vector.load %arg11[%c0_153, %c0_154] : memref<32x2xbf16, #tpu.memory_space<vmem>>, vector<32x2xbf16>
    %cst_155 = arith.constant dense<0.000000e+00> : vector<1x2xf32>
    %197 = tpu.matmul %195, %196, %cst_155 {dimension_numbers = #tpu.dot_dimension_numbers<[1], [0], [0], [1], [0, 0, 1, 1], [], []>} : vector<1x32xbf16>, vector<32x2xbf16>, vector<1x2xf32> -> vector<1x2xf32>
    %cst_156 = arith.constant 0.000000e+00 : f32
    %198 = vector.broadcast %cst_156 : f32 to vector<1x2xf32>
    %199 = arith.maximumf %197, %198 : vector<1x2xf32>
    %200 = arith.truncf %199 : vector<1x2xf32> to vector<1x2xbf16>
    %c0_157 = arith.constant 0 : index
    %c0_158 = arith.constant 0 : index
    %201 = vector.load %arg12[%c0_157, %c0_158] : memref<2x32xbf16, #tpu.memory_space<vmem>>, vector<2x32xbf16>
    %cst_159 = arith.constant dense<0.000000e+00> : vector<1x32xf32>
    %202 = tpu.matmul %200, %201, %cst_159 {dimension_numbers = #tpu.dot_dimension_numbers<[1], [0], [0], [1], [0, 0, 1, 1], [], []>} : vector<1x2xbf16>, vector<2x32xbf16>, vector<1x32xf32> -> vector<1x32xf32>
    %203 = arith.negf %202 : vector<1x32xf32>
    %204 = math.exp %203 : vector<1x32xf32>
    %cst_160 = arith.constant 1.000000e+00 : f32
    %205 = vector.broadcast %cst_160 : f32 to vector<1x32xf32>
    %206 = arith.addf %205, %204 : vector<1x32xf32>
    %207 = arith.divf %205, %206 : vector<1x32xf32>
    %208 = vector.broadcast %207 : vector<1x32xf32> to vector<64x32xf32>
    %209 = arith.mulf %190, %208 : vector<64x32xf32>
    %210 = arith.addf %209, %1 : vector<64x32xf32>
    %cst_161 = arith.constant 0.000000e+00 : f32
    %211 = vector.broadcast %cst_161 : f32 to vector<64x32xf32>
    %212 = arith.maximumf %210, %211 : vector<64x32xf32>
    %c0_162 = arith.constant 0 : index
    %c0_163 = arith.constant 0 : index
    %c0_164 = arith.constant 0 : index
    %213 = vector.load %arg13[%c0_162, %c0_163, %c0_164] : memref<1x64x32xf32, #tpu.memory_space<vmem>>, vector<1x64x32xf32>
    %214 = vector.shape_cast %213 : vector<1x64x32xf32> to vector<64x32xf32>
    %215 = vector.shape_cast %212 : vector<64x32xf32> to vector<1x64x32xf32>
    tpu.vector_store %arg13[%c0_162, %c0_163, %c0_164], %215 {strides = array<i32>} : memref<1x64x32xf32, #tpu.memory_space<vmem>>, vector<1x64x32xf32>,
    return
  }
  func.func @transform_0(%arg0: i32) -> (i32, i32, i32) {
    %c0_i32 = arith.constant 0 : i32
    %c0_i32_0 = arith.constant 0 : i32
    %c0_i32_1 = arith.constant 0 : i32
    return %arg0, %c0_i32, %c0_i32_0 : i32, i32, i32
  }
  func.func @transform_1(%arg0: i32) -> (i32, i32) {
    %c0_i32 = arith.constant 0 : i32
    %c0_i32_0 = arith.constant 0 : i32
    %c0_i32_1 = arith.constant 0 : i32
    return %c0_i32, %c0_i32_0 : i32, i32
  }
  func.func @transform_2(%arg0: i32) -> (i32, i32) {
    %c0_i32 = arith.constant 0 : i32
    %c0_i32_0 = arith.constant 0 : i32
    %c0_i32_1 = arith.constant 0 : i32
    return %c0_i32, %c0_i32_0 : i32, i32
  }
  func.func @transform_3(%arg0: i32) -> (i32, i32) {
    %c0_i32 = arith.constant 0 : i32
    %c0_i32_0 = arith.constant 0 : i32
    %c0_i32_1 = arith.constant 0 : i32
    return %c0_i32, %c0_i32_0 : i32, i32
  }
  func.func @transform_4(%arg0: i32) -> (i32, i32, i32, i32) {
    %c0_i32 = arith.constant 0 : i32
    %c0_i32_0 = arith.constant 0 : i32
    %c0_i32_1 = arith.constant 0 : i32
    %c0_i32_2 = arith.constant 0 : i32
    %c0_i32_3 = arith.constant 0 : i32
    return %c0_i32, %c0_i32_0, %c0_i32_1, %c0_i32_2 : i32, i32, i32, i32
  }
  func.func @transform_5(%arg0: i32) -> (i32, i32) {
    %c0_i32 = arith.constant 0 : i32
    %c0_i32_0 = arith.constant 0 : i32
    %c0_i32_1 = arith.constant 0 : i32
    return %c0_i32, %c0_i32_0 : i32, i32
  }
  func.func @transform_6(%arg0: i32) -> (i32, i32) {
    %c0_i32 = arith.constant 0 : i32
    %c0_i32_0 = arith.constant 0 : i32
    %c0_i32_1 = arith.constant 0 : i32
    return %c0_i32, %c0_i32_0 : i32, i32
  }
  func.func @transform_7(%arg0: i32) -> (i32, i32) {
    %c0_i32 = arith.constant 0 : i32
    %c0_i32_0 = arith.constant 0 : i32
    %c0_i32_1 = arith.constant 0 : i32
    return %c0_i32, %c0_i32_0 : i32, i32
  }
  func.func @transform_8(%arg0: i32) -> (i32, i32) {
    %c0_i32 = arith.constant 0 : i32
    %c0_i32_0 = arith.constant 0 : i32
    %c0_i32_1 = arith.constant 0 : i32
    return %c0_i32, %c0_i32_0 : i32, i32
  }
  func.func @transform_9(%arg0: i32) -> (i32, i32) {
    %c0_i32 = arith.constant 0 : i32
    %c0_i32_0 = arith.constant 0 : i32
    %c0_i32_1 = arith.constant 0 : i32
    return %c0_i32, %c0_i32_0 : i32, i32
  }
  func.func @transform_10(%arg0: i32) -> (i32, i32) {
    %c0_i32 = arith.constant 0 : i32
    %c0_i32_0 = arith.constant 0 : i32
    %c0_i32_1 = arith.constant 0 : i32
    return %c0_i32, %c0_i32_0 : i32, i32
  }
  func.func @transform_11(%arg0: i32) -> (i32, i32) {
    %c0_i32 = arith.constant 0 : i32
    %c0_i32_0 = arith.constant 0 : i32
    %c0_i32_1 = arith.constant 0 : i32
    return %c0_i32, %c0_i32_0 : i32, i32
  }
  func.func @transform_12(%arg0: i32) -> (i32, i32, i32) {
    %c0_i32 = arith.constant 0 : i32
    %c0_i32_0 = arith.constant 0 : i32
    %c0_i32_1 = arith.constant 0 : i32
    return %arg0, %c0_i32, %c0_i32_0 : i32, i32, i32
  }
}

</mosaic_0001>

<bundles_post_ra>
// kernel: se_bottleneck_forward.1
= control target key start
LH: loop header
LB: loop body
LE: loop exit
PB: predicated region body
PF: predicated region fallthrough
CT: control target
= control target key end

     0   :  { %s3489_s0 = inlined_call_operand.vmem [shape: f32[2,64,32], index: 0, kind: input, shape index: {}]   ;;  %s3490_s1 = inlined_call_operand.vmem [shape: bf16[32,8], index: 1, kind: input, shape index: {}]   ;;  %s3491_s2 = inlined_call_operand.vmem [shape: f32[1,8], index: 2, kind: input, shape index: {}]   ;;  %s3492_s3 = inlined_call_operand.vmem [shape: f32[1,8], index: 3, kind: input, shape index: {}]   ;;  %s3493_s4 = inlined_call_operand.vmem [shape: bf16[3,3,8,8], index: 4, kind: input, shape index: {}]   ;;  %s3494_s5 = inlined_call_operand.vmem [shape: f32[1,8], index: 5, kind: input, shape index: {}]   ;;  %s3495_s6 = inlined_call_operand.vmem [shape: f32[1,8], index: 6, kind: input, shape index: {}]   ;;  %s3496_s7 = inlined_call_operand.vmem [shape: bf16[8,32], index: 7, kind: input, shape index: {}]   ;;  %s3497_s8 = inlined_call_operand.vmem [shape: f32[1,32], index: 8, kind: input, shape index: {}]   ;;  %s3498_s9 = inlined_call_operand.vmem [shape: f32[1,32], index: 9, kind: input, shape index: {}]   ;;  %s3499_s10 = inlined_call_operand.vmem [shape: bf16[32,2], index: 10, kind: input, shape index: {}]   ;;  %s3500_s11 = inlined_call_operand.vmem [shape: bf16[2,32], index: 11, kind: input, shape index: {}]   ;;  %s3501_s12 = inlined_call_operand.hbm [shape: f32[2,64,32], index: 12, kind: output, shape index: {}]  }
   0x1   :  { %3505 = sst [smem:[#allocation7_spill]] %s3489_s0 }
   0x2   :  { %3506 = sst [smem:[#allocation8_spill]] %s3490_s1 }
   0x3   :  { %17 = vsyncpa [#allocation5], 0 }
   0x4   :  { %19 = vsyncpa [#allocation5 + $0x1], 0  ;;  %s2744_s21 = smov 0   ;;  %s2746_s22 = smov 0  }
   0x5   :  { %s2748_s23 = smov 0   ;;  %s2750_s24 = smov 0  }
   0x6 LB: > { %s2765_s25 = sadd.s32 4294967295, %s2672_s24   ;;  %s2277_s26 = sadd.s32 4294967294, %s2672_s24   ;;  %s2672_s24 = sphi %s2750_s24, %s3535_s24   ;;  %s2668_s23 = sphi %s2748_s23, %s3534_s23   ;;  %s2664_s22 = sphi %s2746_s22, %s3533_s22   ;;  %s2660_s21 = sphi %s2744_s21, %s3532_s21  }
   0x7   : > { %s2769_s27 = sadd.s32 1, %s2672_s24   ;;  %s289_s28 = sadd.s32 1, %s2668_s23 }
   0x8   : > { %s286_s29 = ssub.s32 %s2672_s24, %s2769_s27  ;;  %p299_p0 = scmp.ne.s32.totalorder %s2668_s23, %s2664_s22 }
   0x9   : > { %p287_p1 = scmp.eq.s32.totalorder %s286_s29, 0  ;;  %p300_p2 = scmp.eq.s32.totalorder %s2765_s25, 1 }
   0xa   : > { %p305_p3 = scmp.ne.s32.totalorder %s2664_s22, %s2660_s21  ;;  %p306_p4 = scmp.eq.s32.totalorder %s2277_s26, 1 }
   0xb   : > { %s2780_s30 = scalar_select %p287_p1, %s2668_s23, %s289_s28  }
   0xc   : > { %p2782_p5 = por %p300_p2, %p299_p0  ;;  %p2786_p6 = por %p306_p4, %p305_p3 }
   0xd   : > { %p2280_p7 = scmp.ge.s32.totalorder %s2672_s24, 1  ;;  %p365_p8 = scmp.lt.s32.totalorder %s2672_s24, 3 }
   0xf   : > { %p366_p9 = pnand %p2280_p7, %p365_p8 }
  0x10   : > { %s3509_s1 = sld [smem:[#allocation8_spill]] (!%p366_p9)  ;;  %p407_p10 = scmp.lt.s32.totalorder (!%p366_p9), %s2765_s25, 1 }
  0x11   : > { %369 = sbr.rel (%p366_p9) target bundleno = 1237 (0x4d5), region = 68  ;;  %s3510_s0 = sld [smem:[#allocation7_spill]] (!%p366_p9) }
  0x12   : > { %s404_s26 = sand.u32 (!%p366_p9), 1, %s2664_s22   ;;  %s2355_s15 = sshll.u32 (!%p366_p9), %s2765_s25, 10 }
  0x13   : > { %s2281_s28 = sshll.u32 (!%p366_p9), %s404_s26, 6 }
  0x14   : > { %s3413_s16 = scalar_lea.vmem (!%p366_p9), [#allocation4], %s2281_s28  ;;  %s2676_s28 = smov (!%p366_p9), [#allocation4]  }
  0x15   : > { %s2215_s17 = sshll.u32 (!%p366_p9), %s3413_s16, 4  ;;  %s3429_s17 = int_to_ptr.vmem [resolvable:$true] %s2215_s17 }
  0x16   : > { %v2596_v0 = vld [vmem:[%s3509_s1 + $0x8] sm:$0xff]   ;;  %v2597_v1 = vld [vmem:[%s3509_s1] sm:$0xff]   ;;  %s408_s19 = scalar_select %p407_p10, %s2765_s25, 1  ;;  %vm3502_vm0 = vcmask 261120   ;;  %vm557_vm1 = vcmask 64512   ;;  %v2674_v14 = vmov 0.0   ;;  %v586_v21 = vlaneseq }
  0x17   : > { %2417 = vmatprep.subr.bf16.mxu0 %v2596_v0  ;;  %562 = vst.msk [vmem:[#allocation2 + $0x20] sm:$0xff] %vm557_vm1, %v2674_v14  ;;  %558 = vst.msk [vmem:[#allocation2] sm:$0xff] %vm557_vm1, %v2674_v14  ;;  %v751_v15 = vld [vmem:[%s3493_s4] sm:$0xf]  ;;  %vm764_vm2 = vcmask 1043456  }
  0x18   : > { %2418 = vmatpush3.bf16.msra.mxu0 %v2596_v0  ;;  %s2354_s20 = sshll.u32 %s408_s19, 6  ;;  %559 = vst.msk [vmem:[#allocation2 + $0x8] sm:$0xff] %vm557_vm1, %v2674_v14  ;;  %560 = vst.msk [vmem:[#allocation2 + $0x10] sm:$0xff] %vm557_vm1, %v2674_v14  ;;  %2543 = vmatprep.subr.msk.bf16.mxu1 %vm764_vm2, %v751_v15  ;;  %v766_v16 = vsel %vm764_vm2, %v751_v15, 0  ;;  %v2301_v17 = vld [vmem:[%s3493_s4 + $0x8] sm:$0xf]  ;;  %s3427_s19 = scalar_lea.hbm %s3501_s12, %s2355_s15 }
  0x19   : > { %2419 = vmatprep.subr.bf16.mxu0 %v2597_v1  ;;  %s2803_s29 = scalar_lea.vmem %s3510_s0, %s2354_s20  ;;  %561 = vst.msk [vmem:[#allocation2 + $0x18] sm:$0xff] %vm557_vm1, %v2674_v14  ;;  %563 = vst.msk [vmem:[#allocation2 + $0x28] sm:$0xff] %vm557_vm1, %v2674_v14  ;;  %2430 = vmatpush3.bf16.msra.mxu1 %v766_v16  ;;  %v1042_v18 = vsel %vm764_vm2, %v2301_v17, 0  ;;  %v2870_v19 = vld [vmem:[%s3493_s4 + $0x4] sm:$0xf]  ;;  %v2881_v22 = vshrl.u32 %v586_v21, 7 }
  0x1a   : > { %v413_v2 = vld [vmem:[%s2803_s29] sm:$0xff]  ;;  %v414_v3 = vld [vmem:[%s2803_s29 + $0x8] sm:$0xff]  ;;  %v415_v4 = vld [vmem:[%s2803_s29 + $0x10] sm:$0xff]  ;;  %564 = vst.msk [vmem:[#allocation2 + $0x30] sm:$0xff] %vm557_vm1, %v2674_v14  ;;  %2544 = vmatprep.subr.msk.bf16.mxu1 %vm764_vm2, %v2870_v19  ;;  %s2612_s20 = scalar_lea.vmem %s3429_s17, 1024  ;;  %s2616_s15 = sshll.u32 %s2676_s28, 4  ;;  %s2617_s15 = int_to_ptr.vmem [resolvable:$false] %s2616_s15 }
  0x1b   : > { %v421_v5 = vpack.c.bf16 %v414_v3, %v413_v2  ;;  %v416_v6 = vld [vmem:[%s2803_s29 + $0x18] sm:$0xff]  ;;  %v417_v7 = vld [vmem:[%s2803_s29 + $0x20] sm:$0xff]  ;;  %v418_v8 = vld [vmem:[%s2803_s29 + $0x28] sm:$0xff]  ;;  %565 = vst.msk [vmem:[#allocation2 + $0x38] sm:$0xff] %vm557_vm1, %v2674_v14  ;;  %v588_v24 = vadd.s32 8, %v2881_v22  ;;  %v599_v27 = vand.u32 7, %v2881_v22  ;;  %p2613_p11 = scmp.ne.s32.totalorder %s3429_s17, %s2612_s20  ;;  %p2619_p0 = scmp.lt.s32.totalorder %s3429_s17, %s2617_s15 }
  0x1c   : > { %2420 = vmatpush3.bf16.msra.mxu0 %v2597_v1  ;;  %v422_v9 = vpack.c.bf16 %v416_v6, %v415_v4  ;;  %v423_v10 = vpack.c.bf16 %v418_v8, %v417_v7  ;;  %v419_v11 = vld [vmem:[%s2803_s29 + $0x30] sm:$0xff]  ;;  %v420_v12 = vld [vmem:[%s2803_s29 + $0x38] sm:$0xff]  ;;  %566 = vst.msk [vmem:[#allocation2 + $0x40] sm:$0xff] %vm557_vm1, %v2674_v14  ;;  %567 = vst.msk [vmem:[#allocation2 + $0x48] sm:$0xff] %vm557_vm1, %v2674_v14  ;;  %v589_v39 = vadd.s32 16, %v2881_v22  ;;  %v590_v40 = vadd.s32 24, %v2881_v22 }
  0x1d   : > { %2421 = vmatprep.mubr.msk.bf16.mxu0 %vm3502_vm0, %v421_v5  ;;  %v424_v13 = vpack.c.bf16 %v420_v12, %v419_v11  ;;  %568 = vst.msk [vmem:[#allocation2 + $0x50] sm:$0xff] %vm557_vm1, %v2674_v14  ;;  %569 = vst.msk [vmem:[#allocation2 + $0x58] sm:$0xff] %vm557_vm1, %v2674_v14  ;;  %2545 = vmatprep.subr.msk.bf16.mxu0 %vm764_vm2, %v2301_v17  ;;  %v2877_v20 = vld [vmem:[%s3493_s4 + $0x10] sm:$0xf]  ;;  %v2290_v23 = vld [vmem:[%s3491_s2] ss:$0 sm:$0xff]  ;;  %p2614_p12 = pnand %p2613_p11, %p2782_p5 }
  0x1e   : > { %578 = vst.msk [vmem:[#allocation3] sm:$0xff] %vm557_vm1, %v2674_v14  ;;  %579 = vst.msk [vmem:[#allocation3 + $0x8] sm:$0xff] %vm557_vm1, %v2674_v14  ;;  %v2890_v26 = vld [vmem:[%s3492_s3] ss:$0 sm:$0xff]  ;;  %v606_v32 = vand.u32 7, %v588_v24  ;;  %v2894_v34 = vadd.s32 4294967295, %v599_v27 }
  0x1f   : > { %2422 = vmatmul.mubr.msk.bf16.vlgmr.msra.gmra.mxu0 %vm3502_vm0, %v422_v9  ;;  %580 = vst.msk [vmem:[#allocation3 + $0x10] sm:$0xff] %vm557_vm1, %v2674_v14  ;;  %581 = vst.msk [vmem:[#allocation3 + $0x18] sm:$0xff] %vm557_vm1, %v2674_v14  ;;  %v2900_v41 = vadd.s32 32, %v2881_v22  ;;  %v691_v50 = vld [vmem:[#allocation2 + $0x7] sm:$0xff]  ;;  %v2910_v51 = vadd.s32 40, %v2881_v22  ;;  %v2912_v53 = vadd.s32 1, %v599_v27  ;;  %p2615_p13 = pneg %p2614_p12 }
  0x20   : > { %2425 = vmatprep.mubr.msk.bf16.mxu0 %vm3502_vm0, %v423_v10  ;;  %582 = vst.msk [vmem:[#allocation3 + $0x20] sm:$0xff] %vm557_vm1, %v2674_v14  ;;  %583 = vst.msk [vmem:[#allocation3 + $0x28] sm:$0xff] %vm557_vm1, %v2674_v14  ;;  %2450 = vmatpush3.bf16.msra.mxu0 %v1042_v18  ;;  %v2904_v45 = vadd.s32 4294967295, %v606_v32  ;;  %vm707_vm3 = vcmp.ge.s32.totalorder %v2894_v34, 0  ;;  %v613_v54 = vand.u32 7, %v589_v39  ;;  %v620_v55 = vand.u32 7, %v590_v40 }
  0x21   : > { %584 = vst.msk [vmem:[#allocation3 + $0x30] sm:$0xff] %vm557_vm1, %v2674_v14  ;;  %585 = vst.msk [vmem:[#allocation3 + $0x38] sm:$0xff] %vm557_vm1, %v2674_v14  ;;  %2547 = vmatprep.subr.msk.bf16.mxu0 %vm764_vm2, %v2877_v20  ;;  %v627_v56 = vand.u32 7, %v2900_v41  ;;  %v731_v61 = vsel %vm707_vm3, %v691_v50, 0.0  ;;  %v2920_v62 = vadd.s32 1, %v606_v32  ;;  %v593_v63 = vadd.s32 48, %v2881_v22 }
  0x22   : > { %vm708_vm4 = vcmp.ge.s32.totalorder %v2904_v45, 0  ;;  %v594_v0 = vadd.s32 56, %v2881_v22  ;;  %v634_v4 = vand.u32 7, %v2910_v51  ;;  %v2927_v6 = vadd.s32 4294967295, %v613_v54  ;;  %s2618_s25 = scalar_lea.vmem %s2617_s15, 2048 }
  0x23   : > { %v2929_v7 = vadd.s32 4294967295, %v620_v55  ;;  %v2931_v8 = vadd.s32 1, %v613_v54  ;;  %v2933_v9 = vadd.s32 1, %v620_v55  ;;  %vm991_vm5 = vcmp.lt.s32.totalorder %v2912_v53, 8  ;;  %v2306_v55 = vld [vmem:[%s3493_s4 + $0xc] sm:$0xf]  ;;  %p2620_p1 = scmp.lt.s32.totalorder %s2618_s25, %s2612_s20 }
  0x24   : > { %v641_v16 = vand.u32 7, %v593_v63  ;;  %v648_v17 = vand.u32 7, %v594_v0  ;;  %vm992_vm6 = vcmp.lt.s32.totalorder %v2920_v62, 8  ;;  %vm709_vm7 = vcmp.ge.s32.totalorder %v2927_v6, 0 }
  0x25   : > { %vm710_vm8 = vcmp.ge.s32.totalorder %v2929_v7, 0  ;;  %vm3503_vm9 = vcmp.lt.s32.totalorder %v2931_v8, 8  ;;  %vm3504_vm10 = vcmp.lt.s32.totalorder %v2933_v9, 8  ;;  %v3000_v51 = vadd.s32 1, %v634_v4  ;;  %p2621_p2 = por %p2620_p1, %p2619_p0 }
  0x26   : > { %v2965_v32 = vadd.s32 4294967295, %v641_v16  ;;  %v2980_v39 = vadd.s32 1, %v648_v17  ;;  %v1286_v54 = vsel %vm764_vm2, %v2877_v20, 0  ;;  %v2321_v20 = vld [vmem:[%s3493_s4 + $0x18] sm:$0xf] }
  0x27   : > { %2426 = vmatmul.mubr.msk.bf16.gmra.mxu0 %vm3502_vm0, %v424_v13  ;;  %v2937_v13 = vadd.s32 4294967295, %v627_v56  ;;  %p2622_p3 = pnand %p2621_p2, %p2615_p13 }
  0x28   : > { %vm713_vm14 = vcmp.ge.s32.totalorder %v2965_v32, 0  ;;  %vm998_vm15 = vcmp.lt.s32.totalorder %v2980_v39, 8  ;;  %v1915_v39 = vld [vmem:[%s3496_s7] sm:$0xf] }
  0x29   : > { %vm711_vm11 = vcmp.ge.s32.totalorder %v2937_v13, 0 }
  0xdf   : > { %v2423_v25 = vpop.f32.mrf.mxu0 }
  0xe0   : > { %v528_v28 = vmul.f32 %v2423_v25, %v2290_v23  ;;  %v2947_v25 = vadd.s32 4294967295, %v634_v4 }
  0xe1   : > { %v488_v29 = vpop.f32.mrf.mxu0 }
  0xe2   : > { %v543_v30 = vadd.f32 %v2890_v26, %v528_v28  ;;  %v526_v31 = vmul.f32 %v2290_v23, %v488_v29  ;;  %vm712_vm12 = vcmp.ge.s32.totalorder %v2947_v25, 0  ;;  %v2326_v25 = vld [vmem:[%s3493_s4 + $0x1c] sm:$0xf] }
  0xe3   : > { %v2424_v33 = vpop.f32.mrf.mxu0 }
  0xe4   : > { %v551_v35 = vmax.f32 %v543_v30, 0.0  ;;  %v541_v36 = vadd.f32 %v2890_v26, %v526_v31  ;;  %v529_v37 = vmul.f32 %v2424_v33, %v2290_v23  ;;  %v2967_v33 = vadd.s32 4294967295, %v648_v17 }
  0xe5   : > { %v491_v38 = vpop.f32.mrf.mxu0 }
  0xe6   : > { %572 = vst.msk [vmem:[#allocation2 + $0x20] sm:$0xff] %vm557_vm1, %v551_v35  ;;  %v549_v42 = vmax.f32 %v541_v36, 0.0  ;;  %v544_v43 = vadd.f32 %v2890_v26, %v529_v37  ;;  %v527_v44 = vmul.f32 %v2290_v23, %v491_v38  ;;  %v2969_v35 = vadd.s32 1, %v627_v56 }
  0xe7   : > { %v2427_v46 = vpop.f32.mrf.mxu0  ;;  %vm714_vm0 = vcmp.ge.s32.totalorder %v2967_v33, 0 }
  0xe8   : > { %570 = vst.msk [vmem:[#allocation2 + $0x10] sm:$0xff] %vm557_vm1, %v549_v42  ;;  %v552_v47 = vmax.f32 %v544_v43, 0.0  ;;  %v542_v48 = vadd.f32 %v2890_v26, %v527_v44  ;;  %v532_v49 = vmul.f32 %v2427_v46, %v2290_v23  ;;  %vm995_vm13 = vcmp.lt.s32.totalorder %v2969_v35, 8  ;;  %v1746_v35 = vld [vmem:[#allocation2 + $0x51] sm:$0xff] }
  0xe9   : > { %v504_v52 = vpop.f32.mrf.mxu0 }
  0xea   : > { %573 = vst.msk [vmem:[#allocation2 + $0x28] sm:$0xff] %vm557_vm1, %v552_v47  ;;  %v550_v57 = vmax.f32 %v542_v48, 0.0  ;;  %v547_v58 = vadd.f32 %v2890_v26, %v532_v49  ;;  %v530_v59 = vmul.f32 %v2290_v23, %v504_v52  ;;  %v884_v47 = vsel %vm764_vm2, %v2870_v19, 0 }
  0xeb   : > { %v2428_v60 = vpop.f32.mrf.mxu0  ;;  %v3002_v52 = vadd.s32 1, %v641_v16 }
  0xec   : > { %571 = vst.msk [vmem:[#allocation2 + $0x18] sm:$0xff] %vm557_vm1, %v550_v57  ;;  %v555_v1 = vmax.f32 %v547_v58, 0.0  ;;  %v545_v2 = vadd.f32 %v2890_v26, %v530_v59  ;;  %v533_v3 = vmul.f32 %v2428_v60, %v2290_v23  ;;  %v849_v59 = vld [vmem:[#allocation2 + $0x8] sm:$0xff] }
  0xed   : > { %v507_v5 = vpop.f32.mrf.mxu0 }
  0xee   : > { %576 = vst.msk [vmem:[#allocation2 + $0x40] sm:$0xff] %vm557_vm1, %v555_v1  ;;  %v553_v10 = vmax.f32 %v545_v2, 0.0  ;;  %v548_v11 = vadd.f32 %v2890_v26, %v533_v3  ;;  %v531_v12 = vmul.f32 %v2290_v23, %v507_v5 }
  0xef   : > { %v2939_v15 = vld [vmem:[#allocation2 + $0xf] sm:$0xff] }
  0xf0   : > { %574 = vst.msk [vmem:[#allocation2 + $0x30] sm:$0xff] %vm557_vm1, %v553_v10  ;;  %v556_v18 = vmax.f32 %v548_v11, 0.0  ;;  %v546_v21 = vadd.f32 %v2890_v26, %v531_v12  ;;  %v732_v24 = vsel %vm708_vm4, %v2939_v15, 0.0  ;;  %v967_v27 = vld [vmem:[#allocation2 + $0x9] sm:$0xff] }
  0xf1   : > { %v747_v23 = vpack.c.bf16 %v732_v24, %v731_v61  ;;  %v2953_v29 = vld [vmem:[#allocation2 + $0x21] sm:$0xff]  ;;  %v1007_v38 = vsel %vm991_vm5, %v967_v27, 0.0  ;;  %v850_v5 = vld [vmem:[#allocation2 + $0x10] sm:$0xff] }
  0xf2   : > { %577 = vst.msk [vmem:[#allocation2 + $0x48] sm:$0xff] %vm557_vm1, %v556_v18  ;;  %v554_v28 = vmax.f32 %v546_v21, 0.0  ;;  %v1010_v42 = vsel %vm3504_vm10, %v2953_v29, 0.0  ;;  %v2991_v43 = vld [vmem:[#allocation2 + $0x27] sm:$0xff]  ;;  %vm997_vm10 = vcmp.lt.s32.totalorder %v3002_v52, 8  ;;  %v865_v24 = vpack.c.bf16 %v850_v5, %v849_v59  ;;  %v1628_v52 = vld [vmem:[#allocation2 + $0x50] sm:$0xff] }
  0xf3   : > { %2431 = vmatprep.mubr.msk.bf16.mxu1 %vm557_vm1, %v747_v23  ;;  %v2959_v26 = vld [vmem:[#allocation2 + $0x17] sm:$0xff]  ;;  %v2961_v30 = vld [vmem:[#allocation2 + $0x1f] sm:$0xff]  ;;  %v735_v19 = vsel %vm711_vm11, %v2991_v43, 0.0  ;;  %v853_v27 = vld [vmem:[#allocation2 + $0x28] sm:$0xff]  ;;  %v1748_v32 = vsel %vm992_vm6, %v2953_v29, 0.0 }
  0xf4   : > { %v2963_v31 = vld [vmem:[#allocation2 + $0x19] sm:$0xff]  ;;  %575 = vst.msk [vmem:[#allocation2 + $0x38] sm:$0xff] %vm557_vm1, %v554_v28  ;;  %v733_v36 = vsel %vm709_vm7, %v2959_v26, 0.0  ;;  %v2975_v37 = vld [vmem:[#allocation2 + $0x11] sm:$0xff]  ;;  %v734_v40 = vsel %vm710_vm8, %v2961_v30, 0.0  ;;  %v1135_v34 = vsel %vm709_vm7, %v2961_v30, 0.0 }
  0xf5   : > { %v1009_v41 = vsel %vm3503_vm9, %v2963_v31, 0.0  ;;  %v1008_v44 = vsel %vm992_vm6, %v2975_v37, 0.0  ;;  %v748_v46 = vpack.c.bf16 %v734_v40, %v733_v36  ;;  %vm996_vm9 = vcmp.lt.s32.totalorder %v3000_v51, 8  ;;  %v1252_v18 = vld [vmem:[#allocation2 + $0x18] sm:$0xff]  ;;  %v852_v36 = vld [vmem:[#allocation2 + $0x20] sm:$0xff] }
  0xf6   : > { %v1023_v48 = vpack.c.bf16 %v1008_v44, %v1007_v38  ;;  %v1024_v49 = vpack.c.bf16 %v1010_v42, %v1009_v41  ;;  %v1267_v23 = vpack.c.bf16 %v1252_v18, %v850_v5  ;;  %v3065_v40 = vpack.c.bf16 %v852_v36, %v1252_v18 }
  0xf7   : > { %v2998_v50 = vld [vmem:[#allocation2 + $0x2f] sm:$0xff]  ;;  %2432 = vmatmul.mubr.msk.bf16.vlgmr.msra.gmra.mxu1 %vm557_vm1, %v748_v46  ;;  %v1268_v42 = vpack.c.bf16 %v853_v27, %v852_v36  ;;  %v1168_v44 = vsel %vm764_vm2, %v2306_v55, 0 }
  0xf8   : > { %2451 = vmatprep.mubr.msk.bf16.mxu0 %vm557_vm1, %v1023_v48  ;;  %v736_v56 = vsel %vm712_vm12, %v2998_v50, 0.0  ;;  %v3020_v57 = vld [vmem:[#allocation2 + $0x29] sm:$0xff]  ;;  %2440 = vmatpush3.bf16.msra.mxu1 %v884_v47  ;;  %v1538_v47 = vsel %vm764_vm2, %v2321_v20, 0  ;;  %v2316_v48 = vld [vmem:[%s3493_s4 + $0x14] sm:$0xf]  ;;  %v1506_v45 = vsel %vm710_vm8, %v2998_v50, 0.0 }
  0xf9   : > { %2452 = vmatmul.mubr.msk.bf16.vlgmr.msra.gmra.mxu0 %vm557_vm1, %v1024_v49  ;;  %v749_v58 = vpack.c.bf16 %v736_v56, %v735_v19  ;;  %v3025_v60 = vld [vmem:[#allocation2 + $0x41] sm:$0xff]  ;;  %2546 = vmatprep.subr.msk.bf16.mxu1 %vm764_vm2, %v2306_v55  ;;  %v1011_v3 = vsel %vm995_vm13, %v3020_v57, 0.0  ;;  %v854_v28 = vld [vmem:[#allocation2 + $0x30] sm:$0xff]  ;;  %v1503_v19 = vsel %vm707_vm3, %v2959_v26, 0.0  ;;  %v1504_v56 = vsel %vm708_vm4, %v2961_v30, 0.0 }
  0xfa   : > { %2470 = vmatpush3.bf16.msra.mxu0 %v1286_v54  ;;  %v1014_v17 = vsel %vm998_vm15, %v3025_v60, 0.0  ;;  %v3067_v41 = vpack.c.bf16 %v854_v28, %v853_v27  ;;  %v2331_v49 = vld [vmem:[%s3493_s4 + $0x20] sm:$0xf]  ;;  %v1134_v54 = vsel %vm708_vm4, %v2959_v26, 0.0  ;;  %v3087_v55 = vld [vmem:[#allocation2 + $0x48] sm:$0xff]  ;;  %v1136_v26 = vsel %vm710_vm8, %v2991_v43, 0.0 }
  0xfb   : > { %v3029_v61 = vld [vmem:[#allocation2 + $0x31] sm:$0xff]  ;;  %2435 = vmatprep.mubr.msk.bf16.mxu1 %vm557_vm1, %v749_v58  ;;  %v3034_v0 = vld [vmem:[#allocation2 + $0x3f] sm:$0xff]  ;;  %2549 = vmatprep.subr.msk.bf16.mxu0 %vm764_vm2, %v2321_v20  ;;  %v1133_v58 = vsel %vm707_vm3, %v2939_v15, 0.0  ;;  %v1150_v5 = vpack.c.bf16 %v1136_v26, %v1135_v34  ;;  %v1782_v18 = vsel %vm764_vm2, %v2331_v49, 0  ;;  %v1132_v6 = vld [vmem:[#allocation2 + $0x47] sm:$0xff]  ;;  %v1747_v27 = vsel %vm991_vm5, %v2963_v31, 0.0 }
  0xfc   : > { %v3032_v63 = vld [vmem:[#allocation2 + $0x37] sm:$0xff]  ;;  %v738_v2 = vsel %vm714_vm0, %v3034_v0, 0.0  ;;  %v1012_v4 = vsel %vm996_vm9, %v3029_v61, 0.0  ;;  %v856_v20 = vld [vmem:[#allocation2 + $0x40] sm:$0xff]  ;;  %v1508_v30 = vsel %vm712_vm12, %v3034_v0, 0.0  ;;  %v1502_v13 = vld [vmem:[#allocation2 + $0x4f] sm:$0xff] }
  0xfd   : > { %v737_v1 = vsel %vm713_vm14, %v3032_v63, 0.0  ;;  %v3052_v10 = vld [vmem:[#allocation2 + $0x39] sm:$0xff]  ;;  %v1025_v12 = vpack.c.bf16 %v1012_v4, %v1011_v3  ;;  %v1519_v3 = vpack.c.bf16 %v1504_v56, %v1503_v19  ;;  %v1138_v15 = vsel %vm712_vm12, %v3032_v63, 0.0 }
  0xfe   : > { %v750_v11 = vpack.c.bf16 %v738_v2, %v737_v1  ;;  %v1013_v16 = vsel %vm997_vm10, %v3052_v10, 0.0  ;;  %v1256_v38 = vld [vmem:[#allocation2 + $0x38] sm:$0xff]  ;;  %v1149_v1 = vpack.c.bf16 %v1134_v54, %v1133_v58  ;;  %v1270_v2 = vpack.c.bf16 %v3087_v55, %v856_v20  ;;  %v1376_v54 = vld [vmem:[#allocation2 + $0x49] sm:$0xff] }
  0xff   : > { %v1026_v21 = vpack.c.bf16 %v1014_v17, %v1013_v16  ;;  %2455 = vmatprep.mubr.msk.bf16.mxu0 %vm557_vm1, %v1025_v12  ;;  %v1269_v46 = vpack.c.bf16 %v1256_v38, %v854_v28  ;;  %v3099_v59 = vpack.c.bf16 %v856_v20, %v1256_v38  ;;  %v1507_v4 = vsel %vm711_vm11, %v3032_v63, 0.0  ;;  %v741_v20 = vld [vmem:[#allocation3 + $0x10] sm:$0xff] }
 0x100   : > { %2436 = vmatmul.mubr.msk.bf16.gmra.mxu1 %vm557_vm1, %v750_v11  ;;  %v1505_v11 = vsel %vm709_vm7, %v2991_v43, 0.0  ;;  %v1137_v12 = vsel %vm711_vm11, %v2998_v50, 0.0  ;;  %v1412_v17 = vsel %vm764_vm2, %v2316_v48, 0  ;;  %v1521_v63 = vpack.c.bf16 %v1508_v30, %v1507_v4 }
 0x101   : > { %2441 = vmatprep.mubr.msk.bf16.mxu1 %vm557_vm1, %v865_v24  ;;  %2456 = vmatmul.mubr.msk.bf16.gmra.mxu0 %vm557_vm1, %v1026_v21  ;;  %v1520_v16 = vpack.c.bf16 %v1506_v45, %v1505_v11  ;;  %v1151_v7 = vpack.c.bf16 %v1138_v15, %v1137_v12  ;;  %v1139_v43 = vsel %vm713_vm14, %v3034_v0, 0.0  ;;  %v1377_v50 = vsel %vm991_vm5, %v2975_v37, 0.0  ;;  %v740_v15 = vld [vmem:[#allocation3 + $0x8] sm:$0xff] }
 0x102   : > { %2471 = vmatprep.mubr.msk.bf16.mxu0 %vm557_vm1, %v1267_v23  ;;  %v1378_v21 = vsel %vm992_vm6, %v2963_v31, 0.0  ;;  %v1509_v24 = vsel %vm713_vm14, %v1132_v6, 0.0  ;;  %v1510_v23 = vsel %vm714_vm0, %v1502_v13, 0.0  ;;  %v1140_v0 = vsel %vm714_vm0, %v1132_v6, 0.0 }
 0x103   : > { %v1152_v37 = vpack.c.bf16 %v1140_v0, %v1139_v43  ;;  %v1393_v28 = vpack.c.bf16 %v1378_v21, %v1377_v50  ;;  %v1522_v36 = vpack.c.bf16 %v1510_v23, %v1509_v24  ;;  %v1763_v38 = vpack.c.bf16 %v1748_v32, %v1747_v27  ;;  %v744_v50 = vld [vmem:[#allocation3 + $0x28] sm:$0xff] }
 0x104   : > { %vm3511_vm0 = vcmp.lt.s32.totalorder %v2933_v9, 8  ;;  %v1381_v62 = vsel %vm995_vm13, %v3029_v61, 0.0  ;;  %v1382_v33 = vsel %vm996_vm9, %v3052_v10, 0.0  ;;  %vm3513_vm4 = vcmp.lt.s32.totalorder %v2931_v8, 8 }
 0x105   : > { %v1380_v53 = vsel %vm3511_vm0, %v3020_v57, 0.0  ;;  %vm3512_vm3 = vmmov %vm3511_vm0  ;;  %v1383_v8 = vsel %vm997_vm10, %v3025_v60, 0.0  ;;  %v1384_v51 = vsel %vm998_vm15, %v1376_v54, 0.0 }
 0x106   : > { %v1750_v31 = vsel %vm3512_vm3, %v3029_v61, 0.0  ;;  %vm3514_vm5 = vmmov %vm3513_vm4  ;;  %v1752_v61 = vsel %vm996_vm9, %v3025_v60, 0.0  ;;  %v1396_v19 = vpack.c.bf16 %v1384_v51, %v1383_v8  ;;  %v1640_v60 = vpack.c.bf16 %v1628_v52, %v3087_v55 }
 0x107   : > { %v1749_v9 = vsel %vm3514_vm5, %v3020_v57, 0.0  ;;  %v1753_v57 = vsel %vm997_vm10, %v1376_v54, 0.0 }
 0x108   : > { %2442 = vmatmul.mubr.msk.bf16.vlgmr.msra.gmra.mxu1 %vm557_vm1, %v3065_v40 }
 0x109   : > { %2445 = vmatprep.mubr.msk.bf16.mxu1 %vm557_vm1, %v3067_v41  ;;  %2472 = vmatmul.mubr.msk.bf16.vlgmr.msra.gmra.mxu0 %vm557_vm1, %v1268_v42  ;;  %v1379_v42 = vsel %vm3513_vm4, %v2953_v29, 0.0 }
 0x10a   : > { %2475 = vmatprep.mubr.msk.bf16.mxu0 %vm557_vm1, %v1269_v46  ;;  %2460 = vmatpush3.bf16.msra.mxu1 %v1168_v44  ;;  %v1751_v44 = vsel %vm995_vm13, %v3052_v10, 0.0  ;;  %v1394_v46 = vpack.c.bf16 %v1380_v53, %v1379_v42  ;;  %v1754_v10 = vsel %vm998_vm15, %v1746_v35, 0.0  ;;  %vm2115_vm13 = vcmask 1040384  }
 0x10b   : > { %2490 = vmatpush3.bf16.msra.mxu0 %v1538_v47  ;;  %2548 = vmatprep.subr.msk.bf16.mxu1 %vm764_vm2, %v2316_v48  ;;  %v1395_v47 = vpack.c.bf16 %v1382_v33, %v1381_v62  ;;  %v1764_v48 = vpack.c.bf16 %v1750_v31, %v1749_v9  ;;  %v1765_v29 = vpack.c.bf16 %v1752_v61, %v1751_v44  ;;  %vm2111_vm15 = vcmask 15360  }
 0x10c   : > { %2551 = vmatprep.subr.msk.bf16.mxu0 %vm764_vm2, %v2331_v49  ;;  %v1656_v49 = vsel %vm764_vm2, %v2326_v25, 0  ;;  %v1766_v56 = vpack.c.bf16 %v1754_v10, %v1753_v57 }
 0x110   : > { %2446 = vmatmul.mubr.msk.bf16.gmra.mxu1 %vm557_vm1, %v3099_v59 }
 0x111   : > { %2461 = vmatprep.mubr.msk.bf16.mxu1 %vm557_vm1, %v1149_v1  ;;  %2476 = vmatmul.mubr.msk.bf16.gmra.mxu0 %vm557_vm1, %v1270_v2 }
 0x112   : > { %2491 = vmatprep.mubr.msk.bf16.mxu0 %vm557_vm1, %v1519_v3  ;;  %v742_v3 = vld [vmem:[#allocation3 + $0x18] sm:$0xff] }
 0x118   : > { %2462 = vmatmul.mubr.msk.bf16.vlgmr.msra.gmra.mxu1 %vm557_vm1, %v1150_v5  ;;  %v745_v5 = vld [vmem:[#allocation3 + $0x30] sm:$0xff] }
 0x119   : > { %2465 = vmatprep.mubr.msk.bf16.mxu1 %vm557_vm1, %v1151_v7  ;;  %2492 = vmatmul.mubr.msk.bf16.vlgmr.msra.gmra.mxu0 %vm557_vm1, %v1520_v16  ;;  %v743_v7 = vld [vmem:[#allocation3 + $0x20] sm:$0xff] }
 0x11a   : > { %2495 = vmatprep.mubr.msk.bf16.mxu0 %vm557_vm1, %v1521_v63  ;;  %2480 = vmatpush3.bf16.msra.mxu1 %v1412_v17 }
 0x11b   : > { %2510 = vmatpush3.bf16.msra.mxu0 %v1782_v18  ;;  %2550 = vmatprep.subr.msk.bf16.mxu1 %vm764_vm2, %v2326_v25  ;;  %v746_v25 = vld [vmem:[#allocation3 + $0x38] sm:$0xff] }
 0x11c   : > { %2529 = vmatprep.subr.bf16.mxu0 %v2674_v14 }
 0x120   : > { %2466 = vmatmul.mubr.msk.bf16.gmra.mxu1 %vm557_vm1, %v1152_v37 }
 0x121   : > { %2481 = vmatprep.mubr.msk.bf16.mxu1 %vm557_vm1, %v1393_v28  ;;  %2496 = vmatmul.mubr.msk.bf16.gmra.mxu0 %vm557_vm1, %v1522_v36 }
 0x122   : > { %2511 = vmatprep.mubr.msk.bf16.mxu0 %vm557_vm1, %v1763_v38 }
 0x128   : > { %2482 = vmatmul.mubr.msk.bf16.vlgmr.msra.gmra.mxu1 %vm557_vm1, %v1394_v46 }
 0x129   : > { %2485 = vmatprep.mubr.msk.bf16.mxu1 %vm557_vm1, %v1395_v47  ;;  %2512 = vmatmul.mubr.msk.bf16.vlgmr.msra.gmra.mxu0 %vm557_vm1, %v1764_v48 }
 0x12a   : > { %2515 = vmatprep.mubr.msk.bf16.mxu0 %vm557_vm1, %v1765_v29  ;;  %2500 = vmatpush3.bf16.msra.mxu1 %v1656_v49 }
 0x12b   : > { %2552 = vmatprep.subr.msk.bf16.mxu1 %vm764_vm2, %v1915_v39 }
 0x130   : > { %2486 = vmatmul.mubr.msk.bf16.gmra.mxu1 %vm557_vm1, %v1396_v19 }
 0x131   : > { %2501 = vmatprep.mubr.msk.bf16.mxu1 %vm557_vm1, %v3065_v40  ;;  %2516 = vmatmul.mubr.msk.bf16.gmra.mxu0 %vm557_vm1, %v1766_v56  ;;  %v1929_v40 = vsel %vm764_vm2, %v1915_v39, 0  ;;  %vm2675_vm2 = vmmov 0  }
 0x132   : > { %2533 = vmatprep.mubr.msk.bf16.mxu0 %vm2675_vm2, %v2674_v14 }
 0x138   : > { %2502 = vmatmul.mubr.msk.bf16.vlgmr.msra.gmra.mxu1 %vm557_vm1, %v3067_v41  ;;  %v739_v41 = vld [vmem:[#allocation3] sm:$0xff] }
 0x139   : > { %2505 = vmatprep.mubr.msk.bf16.mxu1 %vm557_vm1, %v3099_v59  ;;  %2520 = vmatpush3.bf16.msra.mxu1 %v1929_v40 }
 0x140   : > { %2506 = vmatmul.mubr.msk.bf16.gmra.mxu1 %vm557_vm1, %v1640_v60 }
 0x1b7   : > { %v2433_v58 = vpop.f32.mrf.mxu1 }
 0x1b8   : > { %v835_v1 = vadd.f32 %v2433_v58, %v741_v20 }
 0x1b9   : > { %v3220_v2 = vpop.f32.mrf.mxu0  ;;  %v802_v59 = vpop.f32.mrf.mxu1 }
 0x1ba   : > { %843 = vst.msk [vmem:[#allocation3 + $0x10] sm:$0xff] %vm557_vm1, %v835_v1  ;;  %v833_v55 = vadd.f32 %v802_v59, %v739_v41 }
 0x1bb   : > { %v3223_v34 = vpop.f32.mrf.mxu0  ;;  %v2434_v45 = vpop.f32.mrf.mxu1 }
 0x1bc   : > { %841 = vst.msk [vmem:[#allocation3] sm:$0xff] %vm557_vm1, %v833_v55  ;;  %v836_v26 = vadd.f32 %v2434_v45, %v742_v3 }
 0x1bd   : > { %v3226_v4 = vpop.f32.mrf.mxu0  ;;  %v805_v30 = vpop.f32.mrf.mxu1 }
 0x1be   : > { %844 = vst.msk [vmem:[#allocation3 + $0x18] sm:$0xff] %vm557_vm1, %v836_v26  ;;  %v834_v11 = vadd.f32 %v805_v30, %v740_v15 }
 0x1bf   : > { %v3229_v12 = vpop.f32.mrf.mxu0 }
 0x1c0   : > { %v2437_v16 = vpop.f32.mrf.mxu1  ;;  %842 = vst.msk [vmem:[#allocation3 + $0x8] sm:$0xff] %vm557_vm1, %v834_v11 }
 0x1c1   : > { %v839_v17 = vadd.f32 %v2437_v16, %v745_v5  ;;  %v3232_v63 = vpop.f32.mrf.mxu0  ;;  %v859_v37 = vld [vmem:[#allocation3 + $0x10] sm:$0xff] }
 0x1c2   : > { %v818_v18 = vpop.f32.mrf.mxu1 }
 0x1c3   : > { %847 = vst.msk [vmem:[#allocation3 + $0x30] sm:$0xff] %vm557_vm1, %v839_v17  ;;  %v837_v6 = vadd.f32 %v818_v18, %v743_v7  ;;  %v3235_v13 = vpop.f32.mrf.mxu0  ;;  %v857_v38 = vld [vmem:[#allocation3] sm:$0xff] }
 0x1c4   : > { %v2438_v43 = vpop.f32.mrf.mxu1 }
 0x1c5   : > { %845 = vst.msk [vmem:[#allocation3 + $0x20] sm:$0xff] %vm557_vm1, %v837_v6  ;;  %v840_v21 = vadd.f32 %v2438_v43, %v746_v25  ;;  %v3238_v24 = vpop.f32.mrf.mxu0  ;;  %v860_v33 = vld [vmem:[#allocation3 + $0x18] sm:$0xff] }
 0x1c6   : > { %v821_v23 = vpop.f32.mrf.mxu1 }
 0x1c7   : > { %848 = vst.msk [vmem:[#allocation3 + $0x38] sm:$0xff] %vm557_vm1, %v840_v21  ;;  %v838_v0 = vadd.f32 %v821_v23, %v744_v50  ;;  %v3241_v27 = vpop.f32.mrf.mxu0  ;;  %v858_v46 = vld [vmem:[#allocation3 + $0x8] sm:$0xff] }
 0x1c8   : > { %v2443_v28 = vpop.f32.mrf.mxu1 }
 0x1c9   : > { %846 = vst.msk [vmem:[#allocation3 + $0x28] sm:$0xff] %vm557_vm1, %v838_v0  ;;  %v953_v36 = vadd.f32 %v2443_v28, %v859_v37  ;;  %v3244_v32 = vpop.f32.mrf.mxu0 }
 0x1ca   : > { %v920_v53 = vpop.f32.mrf.mxu1  ;;  %v863_v49 = vld [vmem:[#allocation3 + $0x30] sm:$0xff] }
 0x1cb   : > { %961 = vst.msk [vmem:[#allocation3 + $0x10] sm:$0xff] %vm557_vm1, %v953_v36  ;;  %v951_v31 = vadd.f32 %v920_v53, %v857_v38  ;;  %v3247_v62 = vpop.f32.mrf.mxu0 }
 0x1cc   : > { %v2444_v42 = vpop.f32.mrf.mxu1  ;;  %v861_v8 = vld [vmem:[#allocation3 + $0x20] sm:$0xff] }
 0x1cd   : > { %959 = vst.msk [vmem:[#allocation3] sm:$0xff] %vm557_vm1, %v951_v31  ;;  %v954_v44 = vadd.f32 %v2444_v42, %v860_v33  ;;  %v3250_v9 = vpop.f32.mrf.mxu0 }
 0x1ce   : > { %v923_v47 = vpop.f32.mrf.mxu1  ;;  %v864_v52 = vld [vmem:[#allocation3 + $0x38] sm:$0xff] }
 0x1cf   : > { %962 = vst.msk [vmem:[#allocation3 + $0x18] sm:$0xff] %vm557_vm1, %v954_v44  ;;  %v952_v48 = vadd.f32 %v923_v47, %v858_v46  ;;  %v3253_v61 = vpop.f32.mrf.mxu0 }
 0x1d0   : > { %v2447_v29 = vpop.f32.mrf.mxu1  ;;  %v862_v58 = vld [vmem:[#allocation3 + $0x28] sm:$0xff] }
 0x1d1   : > { %960 = vst.msk [vmem:[#allocation3 + $0x8] sm:$0xff] %vm557_vm1, %v952_v48  ;;  %v957_v54 = vadd.f32 %v2447_v29, %v863_v49  ;;  %v3256_v35 = vpop.f32.mrf.mxu0 }
 0x1d2   : > { %v936_v51 = vpop.f32.mrf.mxu1  ;;  %v1017_v57 = vld [vmem:[#allocation3 + $0x10] sm:$0xff] }
 0x1d3   : > { %965 = vst.msk [vmem:[#allocation3 + $0x30] sm:$0xff] %vm557_vm1, %v957_v54  ;;  %v955_v10 = vadd.f32 %v936_v51, %v861_v8  ;;  %v1111_v19 = vadd.f32 %v3220_v2, %v1017_v57  ;;  %v3260_v56 = vpop.f32.mrf.mxu0 }
 0x1d4   : > { %v2448_v60 = vpop.f32.mrf.mxu1  ;;  %v1015_v39 = vld [vmem:[#allocation3] sm:$0xff] }
 0x1d5   : > { %963 = vst.msk [vmem:[#allocation3 + $0x20] sm:$0xff] %vm557_vm1, %v955_v10  ;;  %v958_v40 = vadd.f32 %v2448_v60, %v864_v52  ;;  %1119 = vst.msk [vmem:[#allocation3 + $0x10] sm:$0xff] %vm557_vm1, %v1111_v19  ;;  %v1109_v20 = vadd.f32 %v3223_v34, %v1015_v39  ;;  %v3268_v3 = vpop.f32.mrf.mxu0 }
 0x1d6   : > { %v939_v41 = vpop.f32.mrf.mxu1  ;;  %v1018_v1 = vld [vmem:[#allocation3 + $0x18] sm:$0xff] }
 0x1d7   : > { %966 = vst.msk [vmem:[#allocation3 + $0x38] sm:$0xff] %vm557_vm1, %v958_v40  ;;  %v956_v59 = vadd.f32 %v939_v41, %v862_v58  ;;  %1117 = vst.msk [vmem:[#allocation3] sm:$0xff] %vm557_vm1, %v1109_v20  ;;  %v1112_v2 = vadd.f32 %v3226_v4, %v1018_v1  ;;  %v3275_v5 = vpop.f32.mrf.mxu0 }
 0x1d8   : > { %v2463_v55 = vpop.f32.mrf.mxu1  ;;  %v1016_v45 = vld [vmem:[#allocation3 + $0x8] sm:$0xff] }
 0x1d9   : > { %964 = vst.msk [vmem:[#allocation3 + $0x28] sm:$0xff] %vm557_vm1, %v956_v59  ;;  %1120 = vst.msk [vmem:[#allocation3 + $0x18] sm:$0xff] %vm557_vm1, %v1112_v2  ;;  %v1110_v34 = vadd.f32 %v3229_v12, %v1016_v45  ;;  %v3282_v43 = vpop.f32.mrf.mxu0 }
 0x1da   : > { %v1204_v15 = vpop.f32.mrf.mxu1  ;;  %v1021_v26 = vld [vmem:[#allocation3 + $0x30] sm:$0xff] }
 0x1db   : > { %1118 = vst.msk [vmem:[#allocation3 + $0x8] sm:$0xff] %vm557_vm1, %v1110_v34  ;;  %v1115_v30 = vadd.f32 %v3232_v63, %v1021_v26 }
 0x1dc   : > { %v1143_v11 = vld [vmem:[#allocation3 + $0x10] sm:$0xff]  ;;  %v2464_v4 = vpop.f32.mrf.mxu1  ;;  %v1019_v16 = vld [vmem:[#allocation3 + $0x20] sm:$0xff] }
 0x1dd   : > { %v1237_v7 = vadd.f32 %v2463_v55, %v1143_v11  ;;  %1123 = vst.msk [vmem:[#allocation3 + $0x30] sm:$0xff] %vm557_vm1, %v1115_v30  ;;  %v1113_v17 = vadd.f32 %v3235_v13, %v1019_v16 }
 0x1de   : > { %v1141_v18 = vld [vmem:[#allocation3] sm:$0xff]  ;;  %v1207_v25 = vpop.f32.mrf.mxu1  ;;  %v1022_v6 = vld [vmem:[#allocation3 + $0x38] sm:$0xff] }
 0x1df   : > { %1245 = vst.msk [vmem:[#allocation3 + $0x10] sm:$0xff] %vm557_vm1, %v1237_v7  ;;  %v1235_v12 = vadd.f32 %v1204_v15, %v1141_v18  ;;  %1121 = vst.msk [vmem:[#allocation3 + $0x20] sm:$0xff] %vm557_vm1, %v1113_v17  ;;  %v1116_v63 = vadd.f32 %v3238_v24, %v1022_v6  ;;  %v3289_v24 = vpop.f32.mrf.mxu0 }
 0x1e0   : > { %v1144_v50 = vld [vmem:[#allocation3 + $0x18] sm:$0xff]  ;;  %v2467_v21 = vpop.f32.mrf.mxu1  ;;  %v1020_v23 = vld [vmem:[#allocation3 + $0x28] sm:$0xff] }
 0x1e1   : > { %1243 = vst.msk [vmem:[#allocation3] sm:$0xff] %vm557_vm1, %v1235_v12  ;;  %v1238_v0 = vadd.f32 %v2464_v4, %v1144_v50  ;;  %1124 = vst.msk [vmem:[#allocation3 + $0x38] sm:$0xff] %vm557_vm1, %v1116_v63  ;;  %v1114_v13 = vadd.f32 %v3241_v27, %v1020_v23  ;;  %v3294_v47 = vpop.f32.mrf.mxu0 }
 0x1e2   : > { %v1142_v37 = vld [vmem:[#allocation3 + $0x8] sm:$0xff]  ;;  %v1220_v28 = vpop.f32.mrf.mxu1 }
 0x1e3   : > { %1246 = vst.msk [vmem:[#allocation3 + $0x18] sm:$0xff] %vm557_vm1, %v1238_v0  ;;  %v1236_v36 = vadd.f32 %v1207_v25, %v1142_v37  ;;  %1122 = vst.msk [vmem:[#allocation3 + $0x28] sm:$0xff] %vm557_vm1, %v1114_v13  ;;  %v3302_v52 = vpop.f32.mrf.mxu0 }
 0x1e4   : > { %v1147_v38 = vld [vmem:[#allocation3 + $0x30] sm:$0xff]  ;;  %v2468_v53 = vpop.f32.mrf.mxu1 }
 0x1e5   : > { %1244 = vst.msk [vmem:[#allocation3 + $0x8] sm:$0xff] %vm557_vm1, %v1236_v36  ;;  %v1241_v31 = vadd.f32 %v2467_v21, %v1147_v38  ;;  %v2497_v41 = vpop.f32.mrf.mxu0 }
 0x1e6   : > { %v1145_v33 = vld [vmem:[#allocation3 + $0x20] sm:$0xff]  ;;  %v1223_v42 = vpop.f32.mrf.mxu1  ;;  %v1261_v44 = vld [vmem:[#allocation3 + $0x10] sm:$0xff] }
 0x1e7   : > { %1249 = vst.msk [vmem:[#allocation3 + $0x30] sm:$0xff] %vm557_vm1, %v1241_v31  ;;  %v1239_v27 = vadd.f32 %v1220_v28, %v1145_v33  ;;  %v1355_v46 = vadd.f32 %v3244_v32, %v1261_v44 }
 0x1e8   : > { %v1148_v48 = vld [vmem:[#allocation3 + $0x38] sm:$0xff]  ;;  %v2483_v49 = vpop.f32.mrf.mxu1  ;;  %v1259_v29 = vld [vmem:[#allocation3] sm:$0xff] }
 0x1e9   : > { %1247 = vst.msk [vmem:[#allocation3 + $0x20] sm:$0xff] %vm557_vm1, %v1239_v27  ;;  %v1242_v54 = vadd.f32 %v2468_v53, %v1148_v48  ;;  %1363 = vst.msk [vmem:[#allocation3 + $0x10] sm:$0xff] %vm557_vm1, %v1355_v46  ;;  %v1353_v8 = vadd.f32 %v3247_v62, %v1259_v29 }
 0x1ea   : > { %v1146_v51 = vld [vmem:[#allocation3 + $0x28] sm:$0xff]  ;;  %v1448_v57 = vpop.f32.mrf.mxu1  ;;  %v1262_v10 = vld [vmem:[#allocation3 + $0x18] sm:$0xff] }
 0x1eb   : > { %1250 = vst.msk [vmem:[#allocation3 + $0x38] sm:$0xff] %vm557_vm1, %v1242_v54  ;;  %v1240_v19 = vadd.f32 %v1223_v42, %v1146_v51  ;;  %1361 = vst.msk [vmem:[#allocation3] sm:$0xff] %vm557_vm1, %v1353_v8  ;;  %v1356_v32 = vadd.f32 %v3250_v9, %v1262_v10 }
 0x1ec   : > { %v2484_v60 = vpop.f32.mrf.mxu1  ;;  %v1260_v39 = vld [vmem:[#allocation3 + $0x8] sm:$0xff] }
 0x1ed   : > { %1248 = vst.msk [vmem:[#allocation3 + $0x28] sm:$0xff] %vm557_vm1, %v1240_v19  ;;  %1364 = vst.msk [vmem:[#allocation3 + $0x18] sm:$0xff] %vm557_vm1, %v1356_v32  ;;  %v1354_v62 = vadd.f32 %v3253_v61, %v1260_v39 }
 0x1ee   : > { %v1451_v40 = vpop.f32.mrf.mxu1  ;;  %v1265_v20 = vld [vmem:[#allocation3 + $0x30] sm:$0xff] }
 0x1ef   : > { %1362 = vst.msk [vmem:[#allocation3 + $0x8] sm:$0xff] %vm557_vm1, %v1354_v62  ;;  %v1359_v58 = vadd.f32 %v3256_v35, %v1265_v20  ;;  %v1590_v35 = vpop.f32.mrf.mxu0 }
 0x1f0   : > { %v1387_v1 = vld [vmem:[#allocation3 + $0x10] sm:$0xff]  ;;  %v2487_v59 = vpop.f32.mrf.mxu1  ;;  %v1263_v9 = vld [vmem:[#allocation3 + $0x20] sm:$0xff] }
 0x1f1   : > { %v1481_v2 = vadd.f32 %v2483_v49, %v1387_v1  ;;  %1367 = vst.msk [vmem:[#allocation3 + $0x30] sm:$0xff] %vm557_vm1, %v1359_v58  ;;  %v1357_v55 = vadd.f32 %v3260_v56, %v1263_v9  ;;  %v2498_v25 = vpop.f32.mrf.mxu0 }
 0x1f2   : > { %v1385_v45 = vld [vmem:[#allocation3] sm:$0xff]  ;;  %v1464_v34 = vpop.f32.mrf.mxu1  ;;  %v1266_v15 = vld [vmem:[#allocation3 + $0x38] sm:$0xff] }
 0x1f3   : > { %1489 = vst.msk [vmem:[#allocation3 + $0x10] sm:$0xff] %vm557_vm1, %v1481_v2  ;;  %v1479_v61 = vadd.f32 %v1448_v57, %v1385_v45  ;;  %1365 = vst.msk [vmem:[#allocation3 + $0x20] sm:$0xff] %vm557_vm1, %v1357_v55  ;;  %v1360_v26 = vadd.f32 %v3268_v3, %v1266_v15  ;;  %v1593_v0 = vpop.f32.mrf.mxu0 }
 0x1f4   : > { %v1388_v30 = vld [vmem:[#allocation3 + $0x18] sm:$0xff]  ;;  %v2488_v11 = vpop.f32.mrf.mxu1  ;;  %v1264_v4 = vld [vmem:[#allocation3 + $0x28] sm:$0xff] }
 0x1f5   : > { %1487 = vst.msk [vmem:[#allocation3] sm:$0xff] %vm557_vm1, %v1479_v61  ;;  %v1482_v16 = vadd.f32 %v2484_v60, %v1388_v30  ;;  %1368 = vst.msk [vmem:[#allocation3 + $0x38] sm:$0xff] %vm557_vm1, %v1360_v26  ;;  %v1358_v56 = vadd.f32 %v3275_v5, %v1264_v4  ;;  %v2513_v42 = vpop.f32.mrf.mxu0 }
 0x1f6   : > { %v1386_v7 = vld [vmem:[#allocation3 + $0x8] sm:$0xff]  ;;  %v1467_v17 = vpop.f32.mrf.mxu1 }
 0x1f7   : > { %1490 = vst.msk [vmem:[#allocation3 + $0x18] sm:$0xff] %vm557_vm1, %v1482_v16  ;;  %v1480_v18 = vadd.f32 %v1451_v40, %v1386_v7  ;;  %1366 = vst.msk [vmem:[#allocation3 + $0x28] sm:$0xff] %vm557_vm1, %v1358_v56  ;;  %v1818_v49 = vpop.f32.mrf.mxu0 }
 0x1f8   : > { %v1391_v3 = vld [vmem:[#allocation3 + $0x30] sm:$0xff]  ;;  %v2503_v6 = vpop.f32.mrf.mxu1 }
 0x1f9   : > { %1488 = vst.msk [vmem:[#allocation3 + $0x8] sm:$0xff] %vm557_vm1, %v1480_v18  ;;  %v1485_v12 = vadd.f32 %v2487_v59, %v1391_v3 }
 0x1fa   : > { %v1389_v63 = vld [vmem:[#allocation3 + $0x20] sm:$0xff]  ;;  %v1513_v50 = vld [vmem:[#allocation3 + $0x10] sm:$0xff]  ;;  %v1692_v21 = vpop.f32.mrf.mxu1 }
 0x1fb   : > { %1493 = vst.msk [vmem:[#allocation3 + $0x30] sm:$0xff] %vm557_vm1, %v1485_v12  ;;  %v1483_v23 = vadd.f32 %v1464_v34, %v1389_v63  ;;  %v1607_v5 = vadd.f32 %v3282_v43, %v1513_v50 }
 0x1fc   : > { %v1392_v13 = vld [vmem:[#allocation3 + $0x38] sm:$0xff]  ;;  %v1511_v37 = vld [vmem:[#allocation3] sm:$0xff]  ;;  %v2504_v31 = vpop.f32.mrf.mxu1 }
 0x1fd   : > { %1491 = vst.msk [vmem:[#allocation3 + $0x20] sm:$0xff] %vm557_vm1, %v1483_v23  ;;  %v1486_v28 = vadd.f32 %v2488_v11, %v1392_v13  ;;  %1615 = vst.msk [vmem:[#allocation3 + $0x10] sm:$0xff] %vm557_vm1, %v1607_v5  ;;  %v1605_v36 = vadd.f32 %v3289_v24, %v1511_v37  ;;  %v2336_v23 = vld [vmem:[%s3494_s5] ss:$0 sm:$0xff] }
 0x1fe   : > { %v1390_v38 = vld [vmem:[#allocation3 + $0x28] sm:$0xff]  ;;  %v1514_v53 = vld [vmem:[#allocation3 + $0x18] sm:$0xff]  ;;  %v1695_v46 = vpop.f32.mrf.mxu1 }
 0x1ff   : > { %1494 = vst.msk [vmem:[#allocation3 + $0x38] sm:$0xff] %vm557_vm1, %v1486_v28  ;;  %v1484_v33 = vadd.f32 %v1467_v17, %v1390_v38  ;;  %1613 = vst.msk [vmem:[#allocation3] sm:$0xff] %vm557_vm1, %v1605_v36  ;;  %v1608_v43 = vadd.f32 %v3294_v47, %v1514_v53 }
 0x200   : > { %v1512_v44 = vld [vmem:[#allocation3 + $0x8] sm:$0xff]  ;;  %v2507_v57 = vpop.f32.mrf.mxu1 }
 0x201   : > { %1492 = vst.msk [vmem:[#allocation3 + $0x28] sm:$0xff] %vm557_vm1, %v1484_v33  ;;  %1616 = vst.msk [vmem:[#allocation3 + $0x18] sm:$0xff] %vm557_vm1, %v1608_v43  ;;  %v1606_v27 = vadd.f32 %v3302_v52, %v1512_v44  ;;  %v2514_v52 = vpop.f32.mrf.mxu0  ;;  %v2337_v43 = vld [vmem:[%s3495_s6] ss:$0 sm:$0xff] }
 0x202   : > { %v1517_v24 = vld [vmem:[#allocation3 + $0x30] sm:$0xff]  ;;  %v1708_v58 = vpop.f32.mrf.mxu1 }
 0x203   : > { %1614 = vst.msk [vmem:[#allocation3 + $0x8] sm:$0xff] %vm557_vm1, %v1606_v27  ;;  %v1611_v48 = vadd.f32 %v2497_v41, %v1517_v24  ;;  %v1821_v1 = vpop.f32.mrf.mxu0 }
 0x204   : > { %v1631_v29 = vld [vmem:[#allocation3 + $0x10] sm:$0xff]  ;;  %v1515_v54 = vld [vmem:[#allocation3 + $0x20] sm:$0xff]  ;;  %v2508_v45 = vpop.f32.mrf.mxu1 }
 0x205   : > { %v1725_v8 = vadd.f32 %v2503_v6, %v1631_v29  ;;  %1619 = vst.msk [vmem:[#allocation3 + $0x30] sm:$0xff] %vm557_vm1, %v1611_v48  ;;  %v1609_v47 = vadd.f32 %v1590_v35, %v1515_v54  ;;  %v2517_v61 = vpop.f32.mrf.mxu0 }
 0x206   : > { %v1629_v51 = vld [vmem:[#allocation3] sm:$0xff]  ;;  %v1518_v10 = vld [vmem:[#allocation3 + $0x38] sm:$0xff]  ;;  %v1711_v56 = vpop.f32.mrf.mxu1 }
 0x207   : > { %1733 = vst.msk [vmem:[#allocation3 + $0x10] sm:$0xff] %vm557_vm1, %v1725_v8  ;;  %v1723_v19 = vadd.f32 %v1692_v21, %v1629_v51  ;;  %1617 = vst.msk [vmem:[#allocation3 + $0x20] sm:$0xff] %vm557_vm1, %v1609_v47  ;;  %v1612_v32 = vadd.f32 %v2498_v25, %v1518_v10  ;;  %v1834_v18 = vpop.f32.mrf.mxu0 }
 0x208   : > { %v1632_v60 = vld [vmem:[#allocation3 + $0x18] sm:$0xff]  ;;  %v1516_v39 = vld [vmem:[#allocation3 + $0x28] sm:$0xff] }
 0x209   : > { %1731 = vst.msk [vmem:[#allocation3] sm:$0xff] %vm557_vm1, %v1723_v19  ;;  %v1726_v62 = vadd.f32 %v2504_v31, %v1632_v60  ;;  %1620 = vst.msk [vmem:[#allocation3 + $0x38] sm:$0xff] %vm557_vm1, %v1612_v32  ;;  %v1610_v40 = vadd.f32 %v1593_v0, %v1516_v39  ;;  %v2518_v63 = vpop.f32.mrf.mxu0 }
 0x20a   : > { %v1630_v20 = vld [vmem:[#allocation3 + $0x8] sm:$0xff] }
 0x20b   : > { %1734 = vst.msk [vmem:[#allocation3 + $0x18] sm:$0xff] %vm557_vm1, %v1726_v62  ;;  %v1724_v41 = vadd.f32 %v1695_v46, %v1630_v20  ;;  %1618 = vst.msk [vmem:[#allocation3 + $0x28] sm:$0xff] %vm557_vm1, %v1610_v40  ;;  %v1837_v36 = vpop.f32.mrf.mxu0 }
 0x20c   : > { %v1635_v59 = vld [vmem:[#allocation3 + $0x30] sm:$0xff] }
 0x20d   : > { %1732 = vst.msk [vmem:[#allocation3 + $0x8] sm:$0xff] %vm557_vm1, %v1724_v41  ;;  %v1729_v9 = vadd.f32 %v2507_v57, %v1635_v59 }
 0x20e   : > { %v1757_v2 = vld [vmem:[#allocation3 + $0x10] sm:$0xff]  ;;  %v1633_v55 = vld [vmem:[#allocation3 + $0x20] sm:$0xff] }
 0x20f   : > { %v1851_v34 = vadd.f32 %v2513_v42, %v1757_v2  ;;  %1737 = vst.msk [vmem:[#allocation3 + $0x30] sm:$0xff] %vm557_vm1, %v1729_v9  ;;  %v1727_v15 = vadd.f32 %v1708_v58, %v1633_v55 }
 0x210   : > { %v1755_v26 = vld [vmem:[#allocation3] sm:$0xff]  ;;  %v1636_v35 = vld [vmem:[#allocation3 + $0x38] sm:$0xff] }
 0x211   : > { %1859 = vst.msk [vmem:[#allocation3 + $0x10] sm:$0xff] %vm557_vm1, %v1851_v34  ;;  %v1849_v30 = vadd.f32 %v1818_v49, %v1755_v26  ;;  %1735 = vst.msk [vmem:[#allocation3 + $0x20] sm:$0xff] %vm557_vm1, %v1727_v15  ;;  %v1730_v11 = vadd.f32 %v2508_v45, %v1636_v35  ;;  %v2598_v15 = vld [vmem:[%s3499_s10 + $0x8] sm:$0xff]   ;;  %v2342_v35 = vld [vmem:[%s3497_s8] ss:$0 sm:$0xff] }
 0x212   : > { %v1758_v4 = vld [vmem:[#allocation3 + $0x18] sm:$0xff]  ;;  %v1634_v16 = vld [vmem:[#allocation3 + $0x28] sm:$0xff]  ;;  %2530 = vmatpush3.bf16.msra.mxu0 %v2598_v15 }
 0x213   : > { %1857 = vst.msk [vmem:[#allocation3] sm:$0xff] %vm557_vm1, %v1849_v30  ;;  %v1852_v7 = vadd.f32 %v2514_v52, %v1758_v4  ;;  %1738 = vst.msk [vmem:[#allocation3 + $0x38] sm:$0xff] %vm557_vm1, %v1730_v11  ;;  %v1728_v17 = vadd.f32 %v1711_v56, %v1634_v16  ;;  %2531 = vmatprep.subr.bf16.mxu0 %v2674_v14  ;;  %v2343_v56 = vld [vmem:[%s3498_s9] ss:$0 sm:$0xff] }
 0x214   : > { %v1756_v25 = vld [vmem:[#allocation3 + $0x8] sm:$0xff] }
 0x215   : > { %1860 = vst.msk [vmem:[#allocation3 + $0x18] sm:$0xff] %vm557_vm1, %v1852_v7  ;;  %v1850_v3 = vadd.f32 %v1821_v1, %v1756_v25  ;;  %1736 = vst.msk [vmem:[#allocation3 + $0x28] sm:$0xff] %vm557_vm1, %v1728_v17 }
 0x216   : > { %v1761_v6 = vld [vmem:[#allocation3 + $0x30] sm:$0xff] }
 0x217   : > { %1858 = vst.msk [vmem:[#allocation3 + $0x8] sm:$0xff] %vm557_vm1, %v1850_v3  ;;  %v1855_v12 = vadd.f32 %v2517_v61, %v1761_v6  ;;  %v2599_v61 = vld [vmem:[%s3499_s10] sm:$0xff]  }
 0x218   : > { %v1759_v50 = vld [vmem:[#allocation3 + $0x20] sm:$0xff]  ;;  %v1867_v5 = vld [vmem:[#allocation3 + $0x10] sm:$0xff]  ;;  %2532 = vmatpush3.bf16.msra.mxu0 %v2599_v61 }
 0x219   : > { %1863 = vst.msk [vmem:[#allocation3 + $0x30] sm:$0xff] %vm557_vm1, %v1855_v12  ;;  %v1853_v21 = vadd.f32 %v1834_v18, %v1759_v50  ;;  %v1882_v31 = vmul.f32 %v2336_v23, %v1867_v5  ;;  %2537 = vmatprep.subr.bf16.mxu0 %v2674_v14 }
 0x21a   : > { %v1762_v0 = vld [vmem:[#allocation3 + $0x38] sm:$0xff]  ;;  %v1865_v13 = vld [vmem:[#allocation3] sm:$0xff] }
 0x21b   : > { %1861 = vst.msk [vmem:[#allocation3 + $0x20] sm:$0xff] %vm557_vm1, %v1853_v21  ;;  %v1856_v37 = vadd.f32 %v2518_v63, %v1762_v0  ;;  %v1880_v28 = vmul.f32 %v2336_v23, %v1865_v13  ;;  %v1897_v48 = vadd.f32 %v2337_v43, %v1882_v31 }
 0x21c   : > { %v1760_v38 = vld [vmem:[#allocation3 + $0x28] sm:$0xff]  ;;  %v1868_v53 = vld [vmem:[#allocation3 + $0x18] sm:$0xff] }
 0x21d   : > { %1864 = vst.msk [vmem:[#allocation3 + $0x38] sm:$0xff] %vm557_vm1, %v1856_v37  ;;  %v1854_v33 = vadd.f32 %v1837_v36, %v1760_v38  ;;  %v1883_v42 = vmul.f32 %v2336_v23, %v1868_v53  ;;  %v1895_v46 = vadd.f32 %v2337_v43, %v1880_v28  ;;  %v1905_v10 = vmax.f32 %v1897_v48, 0.0 }
 0x21e   : > { %v1866_v44 = vld [vmem:[#allocation3 + $0x8] sm:$0xff] }
 0x21f   : > { %1862 = vst.msk [vmem:[#allocation3 + $0x28] sm:$0xff] %vm557_vm1, %v1854_v33  ;;  %v1881_v27 = vmul.f32 %v2336_v23, %v1866_v44  ;;  %v1898_v24 = vadd.f32 %v2337_v43, %v1883_v42  ;;  %v1903_v47 = vmax.f32 %v1895_v46, 0.0 }
 0x220   : > { %v1871_v29 = vld [vmem:[#allocation3 + $0x30] sm:$0xff] }
 0x221   : > { %v1896_v49 = vadd.f32 %v2337_v43, %v1881_v27  ;;  %v1906_v54 = vmax.f32 %v1898_v24, 0.0  ;;  %v1886_v32 = vmul.f32 %v2336_v23, %v1871_v29 }
 0x222   : > { %v1869_v8 = vld [vmem:[#allocation3 + $0x20] sm:$0xff] }
 0x223   : > { %v1904_v51 = vmax.f32 %v1896_v49, 0.0  ;;  %v1884_v57 = vmul.f32 %v2336_v23, %v1869_v8  ;;  %v1912_v39 = vpack.c.bf16 %v1906_v54, %v1905_v10  ;;  %v1901_v41 = vadd.f32 %v2337_v43, %v1886_v32 }
 0x224   : > { %v1872_v19 = vld [vmem:[#allocation3 + $0x38] sm:$0xff] }
 0x225   : > { %v1911_v52 = vpack.c.bf16 %v1904_v51, %v1903_v47  ;;  %v1887_v60 = vmul.f32 %v2336_v23, %v1872_v19  ;;  %v1899_v20 = vadd.f32 %v2337_v43, %v1884_v57  ;;  %v1909_v55 = vmax.f32 %v1901_v41, 0.0 }
 0x226   : > { %v1870_v62 = vld [vmem:[#allocation3 + $0x28] sm:$0xff] }
 0x227   : > { %2521 = vmatprep.mubr.msk.bf16.mxu1 %vm557_vm1, %v1911_v52  ;;  %v1885_v40 = vmul.f32 %v2336_v23, %v1870_v62  ;;  %v1902_v58 = vadd.f32 %v2337_v43, %v1887_v60  ;;  %v1907_v9 = vmax.f32 %v1899_v20, 0.0 }
 0x228   : > { %2522 = vmatmul.mubr.msk.bf16.vlgmr.msra.gmra.mxu1 %vm557_vm1, %v1912_v39  ;;  %v2110_v39 = vld [vmem:[%s3500_s11] sm:$0x1] }
 0x229   : > { %v1900_v1 = vadd.f32 %v2337_v43, %v1885_v40  ;;  %v1910_v59 = vmax.f32 %v1902_v58, 0.0  ;;  %v2117_v20 = vsel %vm2115_vm13, %v2110_v39, 0 }
 0x22b   : > { %v1908_v2 = vmax.f32 %v1900_v1, 0.0  ;;  %v1914_v34 = vpack.c.bf16 %v1910_v59, %v1909_v55 }
 0x22d   : > { %v1913_v45 = vpack.c.bf16 %v1908_v2, %v1907_v9 }
 0x22f   : > { %2525 = vmatprep.mubr.msk.bf16.mxu1 %vm557_vm1, %v1913_v45 }
 0x230   : > { %2526 = vmatmul.mubr.msk.bf16.gmra.mxu1 %vm557_vm1, %v1914_v34  ;;  %vm3515_vm1 = vcmask 261120  }
 0x231   : > { %vm3516_vm6 = vmmov %vm3515_vm1 }
 0x232   : > { %vm3517_vm7 = vmmov %vm3515_vm1 }
 0x233   : > { %vm3518_vm8 = vmmov %vm3515_vm1 }
 0x234   : > { %vm3519_vm9 = vmmov %vm3515_vm1 }
 0x235   : > { %vm3520_vm10 = vmmov %vm3515_vm1 }
 0x236   : > { %vm3521_vm11 = vmmov %vm3515_vm1 }
 0x237   : > { %vm3522_vm12 = vmmov %vm3515_vm1 }
 0x238   : > { %vm3523_vm14 = vmmov %vm3515_vm1 }
 0x239   : > { %vm3524_vm0 = vmmov %vm3515_vm1 }
 0x23a   : > { %vm3525_vm3 = vmmov %vm3524_vm0 }
 0x23b   : > { %vm3526_vm4 = vmmov %vm3524_vm0 }
 0x23c   : > { %vm3527_vm5 = vmmov %vm3524_vm0 }
 0x2e8   : > { %v2523_v26 = vpop.f32.mrf.mxu1 }
 0x2e9   : > { %v2005_v16 = vmul.f32 %v2523_v26, %v2342_v35 }
 0x2ea   : > { %v1965_v30 = vpop.f32.mrf.mxu1 }
 0x2eb   : > { %v2003_v11 = vmul.f32 %v2342_v35, %v1965_v30  ;;  %v3380_v6 = vadd.f32 %v2343_v56, %v2005_v16 }
 0x2ec   : > { %v2524_v4 = vpop.f32.mrf.mxu1 }
 0x2ed   : > { %v3378_v17 = vadd.f32 %v2343_v56, %v2003_v11  ;;  %v2006_v18 = vmul.f32 %v2524_v4, %v2342_v35  ;;  %v2029_v37 = vsel %vm3517_vm7, %v3380_v6, 0.0  ;;  %vm3531_vm7 = vmmov %vm3524_vm0 }
 0x2ee   : > { %v1968_v7 = vpop.f32.mrf.mxu1 }
 0x2ef   : > { %v2004_v25 = vmul.f32 %v2342_v35, %v1968_v7  ;;  %v2026_v50 = vsel %vm3515_vm1, %v3378_v17, 0.0  ;;  %v3386_v21 = vadd.f32 %v2343_v56, %v2006_v18  ;;  %vm3529_vm1 = vmmov %vm3524_vm0 }
 0x2f0   : > { %v2527_v3 = vpop.f32.mrf.mxu1 }
 0x2f1   : > { %v3382_v12 = vadd.f32 %v2343_v56, %v2004_v25  ;;  %v2009_v28 = vmul.f32 %v2527_v3, %v2342_v35  ;;  %v2031_v31 = vsel %vm3518_vm8, %v3386_v21, 0.0 }
 0x2f2   : > { %v1981_v63 = vpop.f32.mrf.mxu1 }
 0x2f3   : > { %v2027_v23 = vsel %vm3516_vm6, %v3382_v12, 0.0  ;;  %v2007_v5 = vmul.f32 %v2342_v35, %v1981_v63  ;;  %v2024_v44 = vadd.f32 %v2343_v56, %v2009_v28  ;;  %v2605_v63 = vld [vmem:[%s2803_s29 + $0x8] sm:$0xff]  ;;  %vm3530_vm6 = vmmov %vm3524_vm0 }
 0x2f4   : > { %v2028_v0 = vadd.f32 %v2027_v23, %v2026_v50  ;;  %v2528_v13 = vpop.f32.mrf.mxu1 }
 0x2f5   : > { %v2022_v36 = vadd.f32 %v2343_v56, %v2007_v5  ;;  %v2010_v33 = vmul.f32 %v2528_v13, %v2342_v35  ;;  %v2037_v54 = vsel %vm3521_vm11, %v2024_v44, 0.0 }
 0x2f6   : > { %v2030_v38 = vadd.f32 %v2029_v37, %v2028_v0  ;;  %v1984_v53 = vpop.f32.mrf.mxu1  ;;  %v2608_v0 = vld [vmem:[%s2803_s29 + $0x20] sm:$0xff]  ;;  %v2609_v37 = vld [vmem:[%s2803_s29 + $0x28] sm:$0xff] }
 0x2f7   : > { %v2008_v43 = vmul.f32 %v2342_v35, %v1984_v53  ;;  %v2033_v27 = vsel %vm3519_vm9, %v2022_v36, 0.0  ;;  %v2025_v48 = vadd.f32 %v2343_v56, %v2010_v33  ;;  %v2611_v53 = vld [vmem:[%s2803_s29 + $0x38] sm:$0xff] }
 0x2f8   : > { %v2032_v42 = vadd.f32 %v2031_v31, %v2030_v38 }
 0x2f9   : > { %v2023_v46 = vadd.f32 %v2343_v56, %v2008_v43  ;;  %v2039_v47 = vsel %vm3522_vm12, %v2025_v48, 0.0 }
 0x2fa   : > { %v2034_v24 = vadd.f32 %v2033_v27, %v2032_v42 }
 0x2fb   : > { %v2035_v49 = vsel %vm3520_vm10, %v2023_v46, 0.0 }
 0x2fc   : > { %v2036_v29 = vadd.f32 %v2035_v49, %v2034_v24 }
 0x2fe   : > { %v2038_v8 = vadd.f32 %v2037_v54, %v2036_v29 }
 0x300   : > { %v2040_v51 = vadd.f32 %v2039_v47, %v2038_v8 }
 0x302   : > { %v2041_v57 = vrot.slane %v2040_v51, 4 }
 0x304   : > { %v2042_v10 = vadd.f32 %v2041_v57, %v2040_v51 }
 0x306   : > { %v2043_v19 = vrot.slane %v2042_v10, 2 }
 0x308   : > { %v2044_v32 = vadd.f32 %v2043_v19, %v2042_v10 }
 0x30a   : > { %v2045_v52 = vrot.slane %v2044_v32, 1 }
 0x30c   : > { %v2046_v60 = vadd.f32 %v2045_v52, %v2044_v32 }
 0x30e   : > { %v2047_v62 = vmul.f32 0.015625, %v2046_v60 }
 0x310   : > { %v2048_v40 = vpack.c.bf16 %v2047_v62, %v2047_v62 }
 0x312   : > { %2534 = vmatmul.mubr.msk.bf16.vlgmr.msra.gmra.mxu0 %vm3523_vm14, %v2048_v40 }
 0x313   : > { %2538 = vmatpush3.bf16.msra.mxu0 %v2117_v20  ;;  %2539 = vmatprep.mubr.msk.bf16.mxu0 %vm2675_vm2, %v2674_v14  ;;  %v2167_v14 = vsub.s32 0, %v2881_v22  ;;  %vm3528_vm2 = vmmov %vm3524_vm0 }
 0x3d2   : > { %v2102_v58 = vpop.f32.mrf.mxu0 }
 0x3d3   : > { %v2108_v41 = vmax.f32 %v2102_v58, 0.0 }
 0x3d4   : > { %v2535_v1 = vpop.f32.mrf.mxu0 }
 0x3d5   : > { %v2109_v59 = vpack.c.bf16 %v2108_v41, %v2108_v41 }
 0x3d6   : > { %v2105_v9 = vpop.f32.mrf.mxu0 }
 0x3d7   : > { %2540 = vmatmul.mubr.msk.bf16.vlgmr.msra.gmra.mxu0 %vm2111_vm15, %v2109_v59 }
 0x3d8   : > { %v2536_v2 = vpop.f32.mrf.mxu0 }
 0x497   : > { %v2153_v55 = vpop.f32.mrf.mxu0 }
 0x498   : > { %v2348_v45 = vmul.f32 -1.442695, %v2153_v55 }
 0x499   : > { %v2541_v34 = vpop.f32.mrf.mxu0 }
 0x49a   : > { %2600 = vpow2.f32 %v2348_v45 }
 0x49b   : > { %v2156_v15 = vpop.f32.mrf.mxu0 }
 0x49d   : > { %v2542_v61 = vpop.f32.mrf.mxu0 }
 0x4a7   : > { %v2601_v26 = vpop.eup %2600 }
 0x4a8   : > { %v2162_v35 = vadd.f32 1.0, %v2601_v26 }
 0x4aa   : > { %2602 = vrcp.f32 %v2162_v35 }
 0x4b7   : > { %v2603_v30 = vpop.eup %2602 }
 0x4b8   : > { %v2168_v11 = vrot.slane %v2603_v30, %v2167_v14 }
 0x4ba   : > { %v2169_v4 = vmul.f32 %v2168_v11, %v3378_v17  ;;  %v2170_v16 = vmul.f32 %v2168_v11, %v3382_v12  ;;  %v2171_v56 = vmul.f32 %v2168_v11, %v3380_v6  ;;  %v2172_v7 = vmul.f32 %v2168_v11, %v3386_v21  ;;  %v2604_v17 = vld [vmem:[%s2803_s29] sm:$0xff]  ;;  %v2606_v6 = vld [vmem:[%s2803_s29 + $0x10] sm:$0xff]  ;;  %v2607_v21 = vld [vmem:[%s2803_s29 + $0x18] sm:$0xff] }
 0x4bb   : > { %v2173_v18 = vmul.f32 %v2168_v11, %v2022_v36  ;;  %v2174_v25 = vmul.f32 %v2168_v11, %v2023_v46  ;;  %v2175_v22 = vmul.f32 %v2168_v11, %v2024_v44  ;;  %v2176_v3 = vmul.f32 %v2168_v11, %v2025_v48  ;;  %v2610_v36 = vld [vmem:[%s2803_s29 + $0x30] sm:$0xff]  ;;  %s3449_s29 = scalar_lea.sflag [#allocation5], %s404_s26 }
 0x4bc   : > { %v2177_v12 = vadd.f32 %v2604_v17, %v2169_v4  ;;  %v2178_v50 = vadd.f32 %v2605_v63, %v2170_v16  ;;  %v2179_v23 = vadd.f32 %v2606_v6, %v2171_v56  ;;  %v2180_v5 = vadd.f32 %v2607_v21, %v2172_v7 }
 0x4bd   : > { %v2181_v13 = vadd.f32 %v2608_v0, %v2173_v18  ;;  %v2182_v28 = vadd.f32 %v2609_v37, %v2174_v25  ;;  %v2183_v38 = vadd.f32 %v2610_v36, %v2175_v22  ;;  %v2184_v31 = vadd.f32 %v2611_v53, %v2176_v3 }
 0x4be   : > { %v2185_v33 = vmax.f32 %v2177_v12, 0.0  ;;  %v2186_v43 = vmax.f32 %v2178_v50, 0.0  ;;  %v2187_v42 = vmax.f32 %v2179_v23, 0.0  ;;  %v2188_v44 = vmax.f32 %v2180_v5, 0.0 }
 0x4bf   : > { %v2189_v27 = vmax.f32 %v2181_v13, 0.0  ;;  %v2190_v46 = vmax.f32 %v2182_v28, 0.0  ;;  %v2191_v24 = vmax.f32 %v2183_v38, 0.0  ;;  %v2192_v48 = vmax.f32 %v2184_v31, 0.0 }
 0x4c0   : > { %2193 = vst.msk [vmem:[%s3413_s16] sm:$0xff] %vm3524_vm0, %v2185_v33 }
 0x4c1   : > { %2194 = vst.msk [vmem:[%s3413_s16 + $0x8] sm:$0xff] %vm3525_vm3, %v2186_v43 }
 0x4c2   : > { %2195 = vst.msk [vmem:[%s3413_s16 + $0x10] sm:$0xff] %vm3526_vm4, %v2187_v42 }
 0x4c3   : > { %2196 = vst.msk [vmem:[%s3413_s16 + $0x18] sm:$0xff] %vm3527_vm5, %v2188_v44 }
 0x4c4   : > { %2197 = vst.msk [vmem:[%s3413_s16 + $0x20] sm:$0xff] %vm3528_vm2, %v2189_v27 }
 0x4c5   : > { %2198 = vst.msk [vmem:[%s3413_s16 + $0x28] sm:$0xff] %vm3529_vm1, %v2190_v46 }
 0x4c6   : > { %2199 = vst.msk [vmem:[%s3413_s16 + $0x30] sm:$0xff] %vm3530_vm6, %v2191_v24 }
 0x4c7   : > { %2200 = vst.msk [vmem:[%s3413_s16 + $0x38] sm:$0xff] %vm3531_vm7, %v2192_v48 }
 0x4c8   : > { %2625 = shalt.err (!%p2622_p3)
}
 0x4c9   : > { %s2626_s26 = scalar_lea.hbm %s3427_s19, 1024  ;;  %s2630_s28 = scalar_lea.hbm %s3501_s12, 2048 }
 0x4ca   : > { %p2627_p4 = scmp.ne.s32.totalorder %s3427_s19, %s2626_s26  ;;  %p2631_p9 = scmp.lt.s32.totalorder %s3427_s19, %s3501_s12 }
 0x4cb   : > { %p2632_p10 = scmp.lt.s32.totalorder %s2630_s28, %s2626_s26 }
 0x4cc   : > { %p2628_p7 = pnand %p2627_p4, %p2782_p5 }
 0x4cd   : > { %p2633_p11 = por %p2632_p10, %p2631_p9 }
 0x4ce   : > { %p2629_p8 = pneg %p2628_p7 }
 0x4d0   : > { %p2634_p12 = pnand %p2633_p11, %p2629_p8 }
 0x4d2   : > { %2637 = shalt.err (!%p2634_p12)
}
 0x4d3   : > { %s2677_s20 = smov 128   ;;  %s2678_s15 = smov 8  }
 0x4d4   : > { %2553 = dma.vmem_to_hbm [thread:$0]  (%p2782_p5), %s3429_s17, 1024, %s3427_s19, %s3449_s29, %s2677_s20, %s2677_s20, %s2678_s15  }
 0x4d5 PF: > { %p2559_p13 = scmp.ge.s32.totalorder %s2672_s24, 2  ;;  %s2230_s25 = sand.u32 1, %s2660_s21  }
 0x4d6   : > { %s2231_s0 = scalar_lea.sflag [#allocation5], %s2230_s25 }
 0x4d7   : > { %p2556_p0 = pnand %p2559_p13, %p2786_p6 }
 0x4d9   : > { %p2557_p1 = pneg %p2556_p0 }
 0x4db   : > { %2655 = dma.done.wait (%p2557_p1), %s2231_s0, 1024  }
 0x4dc   : > { %2657 = vsyncadd (%p2557_p1), %s2231_s0, 4294966272  ;;  %p22_p2 = scmp.ge.s32.totalorder %s2769_s27, 4   ;;  %s3532_s21 = smov %s2664_s22 }
 0x4dd   : > { %s3533_s22 = smov %s2668_s23  ;;  %s3534_s23 = smov %s2780_s30 }
 0x4de   : > { %s3535_s24 = smov %s2769_s27  ;;  %24 = sbr.rel (!%p22_p2) target bundleno = 6 (0x6), region = 111 }
 0x4e3   :  { %2236 = vsyncpa [#allocation5], 1 }
 0x4e4   :  { %2238 = vsyncpa [#allocation5 + $0x1], 1 }

</bundles_post_ra>
